<compile_context>
chip_gen: v6e
topology: v6e:2x2x1
jax: 0.10.0
libtpu: 0.0.40
codegen_flags: <defaults>
</compile_context>

<pallas_src>
import functools

import jax
import jax.numpy as jnp
from jax.experimental import pallas as pl
from jax.experimental.pallas import tpu as pltpu


# ---------------------------------------------------------------------------
# helpers
# ---------------------------------------------------------------------------
def _round_up(x, m):
    return (x + m - 1) // m * m


def _vmem_capacity_bytes():
    """Physical VMEM of the current chip; conservative fallback if query fails."""
    try:
        return int(pltpu.get_tpu_info().vmem_capacity_bytes)
    except Exception:
        return 64 << 20  # v7x-sized fallback: safe on every generation


def _pick_tile(total, cap):
    """Largest multiple of 128 that divides `total` (itself a multiple of 128)
    and is <= cap."""
    t = min(total, max(128, (cap // 128) * 128))
    while total % t:
        t -= 128
    return t


# ---------------------------------------------------------------------------
# fused  (B, K) @ (K, N) + b  kernel, accumulating over K tiles into o_ref
# ---------------------------------------------------------------------------
def _linear_kernel(x_ref, w_ref, b_ref, o_ref, *, tk, x_resident):
    k = pl.program_id(1)

    @pl.when(k == 0)
    def _init():
        # Output block is resident across the K reduction (same block index for
        # all k), so it doubles as the accumulator; fold the bias into the init.
        o_ref[...] = jnp.broadcast_to(b_ref[...], o_ref.shape)

    if x_resident:
        x = x_ref[:, pl.ds(pl.multiple_of(k * tk, 128), tk)]
    else:
        x = x_ref[...]
    o_ref[...] += jnp.dot(x, w_ref[...], preferred_element_type=jnp.float32)


def linear(x, w, b):
    """x: (B, K) f32, w: (K, N) f32, b: (N,) f32  ->  x @ w + b, f32 (B, N)."""
    B, K = x.shape
    N = w.shape[-1]

    # ---- generation-aware VMEM budget ------------------------------------
    vmem_cap = _vmem_capacity_bytes()            # 128 MiB v5e/v6e, 64 MiB v7x
    vmem_limit = (vmem_cap * 3) // 4             # scoped limit requested (96 / 48 MiB)
    budget = (vmem_limit * 3) // 5               # what our own buffers may use

    # ---- pad K / N up to lane multiples -----------------------------------
    Kp = _round_up(K, 128)
    Np = _round_up(N, 128)

    # ---- tiles: prefer tn = full N (contiguous W rows), then grow tk ------
    W_ELEM = 2  # bf16 weight stream
    tn_cap = max(128, (budget // 2) // (2 * 128 * W_ELEM))
    tn = _pick_tile(Np, min(Np, tn_cap))

    x_bytes = B * Kp * 2                          # bf16 activations
    x_resident = x_bytes <= min(budget // 4, 8 << 20)
    fixed = 2 * B * tn * 4 + (x_bytes if x_resident else 4 * B * 128 * 2)
    tk_cap = max(128, (budget - fixed) // (2 * tn * W_ELEM))
    tk = _pick_tile(Kp, min(Kp, tk_cap, 8192))

    grid = (Np // tn, Kp // tk)                   # (1, 1) at demo scale

    # ---- pad + cast operands (bf16 stream, f32 accumulate) ----------------
    if Kp != K:
        x = jnp.pad(x, ((0, 0), (0, Kp - K)))
        w = jnp.pad(w, ((0, Kp - K), (0, 0)))
    if Np != N:
        w = jnp.pad(w, ((0, 0), (0, Np - N)))
        b = jnp.pad(b, (0, Np - N))
    x_bf = x.astype(jnp.bfloat16)
    w_bf = w.astype(jnp.bfloat16)
    b2 = b.reshape(1, Np).astype(jnp.float32)

    if x_resident:
        # Fully resident activations: fetched once, sliced in-kernel per K step.
        x_spec = pl.BlockSpec((B, Kp), lambda j, k: (0, 0))
    else:
        x_spec = pl.BlockSpec((B, tk), lambda j, k: (0, k))

    out = pl.pallas_call(
        functools.partial(_linear_kernel, tk=tk, x_resident=x_resident),
        out_shape=jax.ShapeDtypeStruct((B, Np), jnp.float32),
        grid_spec=pltpu.PrefetchScalarGridSpec(
            num_scalar_prefetch=0,
            grid=grid,
            in_specs=[
                x_spec,                                        # activations
                pl.BlockSpec((tk, tn), lambda j, k: (k, j)),   # weight tile
                pl.BlockSpec((1, tn), lambda j, k: (0, j)),    # bias tile
            ],
            out_specs=pl.BlockSpec((B, tn), lambda j, k: (0, j)),
        ),
        compiler_params=pltpu.CompilerParams(
            dimension_semantics=("parallel", "arbitrary"),
            vmem_limit_bytes=int(vmem_limit),
        ),
        cost_estimate=pl.CostEstimate(
            flops=2 * B * Kp * Np,
            transcendentals=0,
            bytes_accessed=2 * Kp * Np + 2 * B * Kp + 4 * B * Np,
        ),
    )(x_bf, w_bf, b2)

    return out[:, :N] if Np != N else out


# ---------------------------------------------------------------------------
# FullyConnectedEncoder forward
# ---------------------------------------------------------------------------
def fully_connected_encoder_forward(videos, params):
    """videos: (B, C, T, W, H)  ->  (B, num_features)."""
    B = videos.shape[0]
    x = videos.reshape(B, -1).astype(jnp.float32)  # == video_batch.view(B, -1)
    return linear(x, params["w"], params["b"])


def init_params(key, video_dims, num_features):
    """PyTorch nn.Linear default init; weight stored pre-transposed as (K, N)."""
    C, T, W, H = video_dims
    K = C * T * W * H
    kw, kb = jax.random.split(key)
    bound = 1.0 / (K ** 0.5)
    w = jax.random.uniform(kw, (K, num_features), jnp.float32, -bound, bound)
    b = jax.random.uniform(kb, (num_features,), jnp.float32, -bound, bound)
    return {"w": w, "b": b}


if __name__ == "__main__":
    key = jax.random.PRNGKey(0)
    k_video, k_params = jax.random.split(key)

    # Small shapes consistent with the module: B=2, C=4, T=8, 16x16 spatial.
    B, C, T, W, H = 2, 4, 8, 16, 16          # K = C*T*W*H = 8192
    num_features = 128

    videos = jax.random.normal(k_video, (B, C, T, W, H), jnp.float32)
    params = init_params(k_params, (C, T, W, H), num_features)

    fwd = jax.jit(functools.partial(fully_connected_encoder_forward, params=params))
    out = fwd(videos)
    jax.block_until_ready(out)

    # sanity: shape, finiteness, and agreement with a plain-JAX reference that
    # uses the same bf16 streaming precision (f32 accumulation).
    assert out.shape == (B, num_features), out.shape
    assert bool(jnp.all(jnp.isfinite(out)))
    xv = videos.reshape(B, -1)
    ref = (xv.astype(jnp.bfloat16).astype(jnp.float32)
           @ params["w"].astype(jnp.bfloat16).astype(jnp.float32)) + params["b"]
    assert bool(jnp.allclose(out, ref, atol=1e-2, rtol=1e-2)), \
        float(jnp.max(jnp.abs(out - ref)))

    print("KERNEL_OK")
</pallas_src>

<mosaic_0001>
module attributes {stable_mosaic.version = 11 : i64} {
  func.func @_linear_kernel(%arg0: i32, %arg1: i32, %arg2: memref<2x8192xbf16, #tpu.memory_space<vmem>>, %arg3: memref<8192x128xbf16, #tpu.memory_space<vmem>>, %arg4: memref<1x128xf32, #tpu.memory_space<vmem>>, %arg5: memref<2x128xf32, #tpu.memory_space<vmem>>) attributes {dimension_semantics = [#tpu.dimension_semantics<parallel>, #tpu.dimension_semantics<arbitrary>], iteration_bounds = array<i64: 1, 1>, scalar_prefetch = 0 : i64, scratch_operands = 0 : i64, tpu.core_type = #tpu.core_type<tc>, window_params = [{pipeline_mode = #tpu.pipeline_mode<synchronous>, transform_indices = @transform_0, window_bounds = array<i64: 2, 8192>}, {transform_indices = @transform_1, window_bounds = array<i64: 8192, 128>}, {transform_indices = @transform_2, window_bounds = array<i64: 1, 128>}, {transform_indices = @transform_3, window_bounds = array<i64: 2, 128>}]} {
    %c0_i32 = arith.constant 0 : i32
    %0 = arith.cmpi eq, %arg1, %c0_i32 : i32
    %1 = arith.extui %0 : i1 to i32
    %c0_i32_0 = arith.constant 0 : i32
    %2 = arith.cmpi ne, %1, %c0_i32_0 : i32
    scf.if %2 {
      %c0_7 = arith.constant 0 : index
      %c0_8 = arith.constant 0 : index
      %12 = vector.load %arg4[%c0_7, %c0_8] : memref<1x128xf32, #tpu.memory_space<vmem>>, vector<1x128xf32>
      %13 = vector.shape_cast %12 : vector<1x128xf32> to vector<1x128xf32>
      %14 = vector.broadcast %13 : vector<1x128xf32> to vector<2x128xf32>
      %c0_9 = arith.constant 0 : index
      %c0_10 = arith.constant 0 : index
      %15 = vector.load %arg5[%c0_9, %c0_10] : memref<2x128xf32, #tpu.memory_space<vmem>>, vector<2x128xf32>
      tpu.vector_store %arg5[%c0_9, %c0_10], %14 {strides = array<i32>} : memref<2x128xf32, #tpu.memory_space<vmem>>, vector<2x128xf32>,
    } else {
    }
    %c8192_i32 = arith.constant 8192 : i32
    %3 = arith.muli %arg1, %c8192_i32 : i32
    %4 = tpu.assume_multiple %3, 128 : i32
    %c0 = arith.constant 0 : index
    %5 = arith.index_cast %4 : i32 to index
    %6 = vector.load %arg2[%c0, %5] : memref<2x8192xbf16, #tpu.memory_space<vmem>>, vector<2x8192xbf16>
    %c0_1 = arith.constant 0 : index
    %c0_2 = arith.constant 0 : index
    %7 = vector.load %arg5[%c0_1, %c0_2] : memref<2x128xf32, #tpu.memory_space<vmem>>, vector<2x128xf32>
    %c0_3 = arith.constant 0 : index
    %c0_4 = arith.constant 0 : index
    %8 = vector.load %arg3[%c0_3, %c0_4] : memref<8192x128xbf16, #tpu.memory_space<vmem>>, vector<8192x128xbf16>
    %cst = arith.constant dense<0.000000e+00> : vector<2x128xf32>
    %9 = tpu.matmul %6, %8, %cst {dimension_numbers = #tpu.dot_dimension_numbers<[1], [0], [0], [1], [0, 0, 1, 1], [], []>} : vector<2x8192xbf16>, vector<8192x128xbf16>, vector<2x128xf32> -> vector<2x128xf32>
    %10 = arith.addf %7, %9 : vector<2x128xf32>
    %c0_5 = arith.constant 0 : index
    %c0_6 = arith.constant 0 : index
    %11 = vector.load %arg5[%c0_5, %c0_6] : memref<2x128xf32, #tpu.memory_space<vmem>>, vector<2x128xf32>
    tpu.vector_store %arg5[%c0_5, %c0_6], %10 {strides = array<i32>} : memref<2x128xf32, #tpu.memory_space<vmem>>, vector<2x128xf32>,
    return
  }
  func.func @transform_0(%arg0: i32, %arg1: i32) -> (i32, i32) {
    %c0_i32 = arith.constant 0 : i32
    %c0_i32_0 = arith.constant 0 : i32
    %c0_i32_1 = arith.constant 0 : i32
    return %c0_i32, %c0_i32_0 : i32, i32
  }
  func.func @transform_1(%arg0: i32, %arg1: i32) -> (i32, i32) {
    %c0_i32 = arith.constant 0 : i32
    return %arg1, %arg0 : i32, i32
  }
  func.func @transform_2(%arg0: i32, %arg1: i32) -> (i32, i32) {
    %c0_i32 = arith.constant 0 : i32
    %c0_i32_0 = arith.constant 0 : i32
    return %c0_i32, %arg0 : i32, i32
  }
  func.func @transform_3(%arg0: i32, %arg1: i32) -> (i32, i32) {
    %c0_i32 = arith.constant 0 : i32
    %c0_i32_0 = arith.constant 0 : i32
    return %c0_i32, %arg0 : i32, i32
  }
}

</mosaic_0001>

<bundles_post_ra>
// kernel: fully_connected_encoder_forward.1
= control target key start
LH: loop header
LB: loop body
LE: loop exit
PB: predicated region body
PF: predicated region fallthrough
CT: control target
= control target key end

     0   :  { %8 = vsyncpa [#allocation3], 0  ;;  %s7908_s0 = inlined_call_operand.vmem [shape: bf16[2,8192], index: 0, kind: input, shape index: {}]   ;;  %s7909_s1 = inlined_call_operand.hbm [shape: bf16[8192,128], index: 1, kind: input, shape index: {}]   ;;  %s7910_s2 = inlined_call_operand.hbm [shape: f32[1,128], index: 2, kind: input, shape index: {}]   ;;  %s7911_s3 = inlined_call_operand.hbm [shape: f32[2,128], index: 3, kind: output, shape index: {}]  }
   0x1   :  { %9 = vsyncpa [#allocation6], 0 }
   0x2   :  { %10 = vsyncpa [#allocation4], 0  ;;  %s7735_s12 = smov [#allocation2]  }
   0x3   :  { %s18_s13 = sshll.u32 %s7735_s12, 4  ;;  %s19_s13 = int_to_ptr.vmem [resolvable:$true] %s18_s13 }
   0x4   :  { %s7677_s14 = scalar_lea.vmem %s19_s13, 65536  ;;  %p7682_p1 = scmp.lt.s32.totalorder %s19_s13, %s19_s13 }
   0x5   :  { %p7678_p0 = scmp.ne.s32.totalorder %s19_s13, %s7677_s14  ;;  %p7683_p2 = scmp.lt.s32.totalorder %s7677_s14, %s7677_s14 }
   0x7   :  { %p7684_p3 = por %p7683_p2, %p7682_p1 }
   0x9   :  { %p7685_p4 = pnand %p7684_p3, %p7678_p0 }
   0xb   :  { %7688 = shalt.err (!%p7685_p4)
}
   0xc   :  { %s7736_s15 = smov 64   ;;  %s7737_s16 = smov 4  }
   0xd   :  { %24 = dma.hbm_to_vmem [thread:$0]  %s7909_s1, 65536, %s19_s13, [#allocation3], %s7736_s15, %s7736_s15, %s7737_s16  }
   0xe   :  { %s7738_s19 = smov [#allocation5]  }
   0xf   :  { %s31_s20 = sshll.u32 %s7738_s19, 4  ;;  %s32_s20 = int_to_ptr.vmem [resolvable:$true] %s31_s20 }
  0x10   :  { %s7697_s21 = scalar_lea.vmem %s32_s20, 16  ;;  %s7701_s22 = scalar_lea.vmem %s32_s20, 32 }
  0x11   :  { %p7698_p5 = scmp.ne.s32.totalorder %s32_s20, %s7697_s21  ;;  %p7702_p6 = scmp.lt.s32.totalorder %s32_s20, %s32_s20 }
  0x12   :  { %p7703_p7 = scmp.lt.s32.totalorder %s7701_s22, %s7697_s21 }
  0x14   :  { %p7704_p8 = por %p7703_p7, %p7702_p6 }
  0x16   :  { %p7705_p9 = pnand %p7704_p8, %p7698_p5 }
  0x18   :  { %7708 = shalt.err (!%p7705_p9)
}
  0x19   :  { %34 = dma.hbm_to_vmem [thread:$0]  %s7910_s2, 16, %s32_s20, [#allocation6]  }
  0x1a   :  { %7729 = dma.done.wait [#allocation3], 65536  }
  0x1b   :  { %7730 = vsyncadd [#allocation3], 4294901760 }
  0x1c   :  { %7731 = dma.done.wait [#allocation6], 16  }
  0x1d   :  { %7732 = vsyncadd [#allocation6], 4294967280  ;;  %v7149_v0 = vld [vmem:[#allocation2 + $0x78] sm:$0xff]   ;;  %v7153_v4 = vld [vmem:[#allocation2 + $0x70] sm:$0xff]   ;;  %v7739_v22 = vmov 1966171168   ;;  %v1103_v24 = vlaneseq }
  0x1e   :  { %v7150_v1 = vld [vmem:[#allocation2 + $0xf8] sm:$0xff]   ;;  %6439 = vmatprep.subr.bf16.mxu0 %v7149_v0  ;;  %v7154_v5 = vld [vmem:[#allocation2 + $0xf0] sm:$0xff]   ;;  %v7157_v8 = vld [vmem:[#allocation2 + $0x68] sm:$0xff]   ;;  %v1101_v23 = vunpack.c.l.s4 %v7739_v22 }
  0x1f   :  { %v7151_v2 = vld [vmem:[#allocation2 + $0x38] sm:$0xff]   ;;  %6461 = vmatprep.subr.bf16.mxu1 %v7150_v1  ;;  %v7155_v6 = vld [vmem:[#allocation2 + $0x30] sm:$0xff]   ;;  %v7158_v9 = vld [vmem:[#allocation2 + $0xe8] sm:$0xff]   ;;  %v1104_v30 = vshrl.u32 %v1103_v24, 7 }
  0x20   :  { %v7152_v3 = vld [vmem:[#allocation2 + $0xb8] sm:$0xff]   ;;  %6440 = vmatpush3.bf16.msra.mxu0 %v7151_v2  ;;  %v7156_v7 = vld [vmem:[#allocation2 + $0xb0] sm:$0xff]   ;;  %v7159_v10 = vld [vmem:[#allocation2 + $0x28] sm:$0xff]   ;;  %v1102_v29 = vunpack.c.0.s8 %v1101_v23 }
  0x21   :  { %6462 = vmatpush3.bf16.msra.mxu1 %v7152_v3  ;;  %6441 = vmatprep.subr.bf16.mxu0 %v7153_v4  ;;  %v7160_v11 = vld [vmem:[#allocation2 + $0xa8] sm:$0xff]   ;;  %v7161_v12 = vld [vmem:[#allocation2 + $0x60] sm:$0xff]   ;;  %v7165_v16 = vld [vmem:[#allocation2 + $0x58] sm:$0xff]  }
  0x22   :  { %6463 = vmatprep.subr.bf16.mxu1 %v7154_v5  ;;  %v7162_v13 = vld [vmem:[#allocation2 + $0xe0] sm:$0xff]   ;;  %v7166_v17 = vld [vmem:[#allocation2 + $0xd8] sm:$0xff]   ;;  %v7169_v20 = vld [vmem:[#allocation2 + $0x50] sm:$0xff]   ;;  %v7767_v35 = vsub.s32 %v1102_v29, %v1104_v30 }
  0x23   :  { %v7163_v14 = vld [vmem:[#allocation2 + $0x20] sm:$0xff]   ;;  %v7167_v18 = vld [vmem:[#allocation2 + $0x18] sm:$0xff]   ;;  %v7170_v21 = vld [vmem:[#allocation2 + $0xd0] sm:$0xff]  }
  0x24   :  { %6442 = vmatpush3.bf16.msra.mxu0 %v7155_v6  ;;  %v7164_v15 = vld [vmem:[#allocation2 + $0xa0] sm:$0xff]   ;;  %v7168_v19 = vld [vmem:[#allocation2 + $0x98] sm:$0xff]   ;;  %v7171_v25 = vld [vmem:[#allocation2 + $0x10] sm:$0xff]  }
  0x25   :  { %6464 = vmatpush3.bf16.msra.mxu1 %v7156_v7  ;;  %6443 = vmatprep.subr.bf16.mxu0 %v7157_v8  ;;  %v7172_v26 = vld [vmem:[#allocation2 + $0x90] sm:$0xff]   ;;  %v7173_v27 = vld [vmem:[#allocation2 + $0x48] sm:$0xff]   ;;  %v7177_v33 = vld [vmem:[#allocation2 + $0x40] sm:$0xff]  }
  0x26   :  { %6465 = vmatprep.subr.bf16.mxu1 %v7158_v9  ;;  %v7174_v28 = vld [vmem:[#allocation2 + $0xc8] sm:$0xff]   ;;  %v7178_v34 = vld [vmem:[#allocation2 + $0xc0] sm:$0xff]   ;;  %v7182_v41 = vld [vmem:[#allocation2 + $0x178] sm:$0xff]  }
  0x27   :  { %v7175_v31 = vld [vmem:[#allocation2 + $0x8] sm:$0xff]   ;;  %v7179_v36 = vld [vmem:[#allocation2] sm:$0xff]   ;;  %v7183_v42 = vld [vmem:[#allocation2 + $0x1f8] sm:$0xff]  }
  0x28   :  { %6444 = vmatpush3.bf16.msra.mxu0 %v7159_v10  ;;  %v7176_v32 = vld [vmem:[#allocation2 + $0x88] sm:$0xff]   ;;  %v7180_v37 = vld [vmem:[#allocation2 + $0x80] sm:$0xff]   ;;  %v7184_v46 = vld [vmem:[#allocation2 + $0x138] sm:$0xff]  }
  0x29   :  { %6466 = vmatpush3.bf16.msra.mxu1 %v7160_v11  ;;  %6445 = vmatprep.subr.bf16.mxu0 %v7161_v12  ;;  %v58_v38 = vld [vmem:[%s7908_s0] sm:$0xff]  ;;  %v7185_v48 = vld [vmem:[#allocation2 + $0x1b8] sm:$0xff]   ;;  %v7186_v51 = vld [vmem:[#allocation2 + $0x170] sm:$0xff]  }
  0x2a   :  { %6467 = vmatprep.subr.bf16.mxu1 %v7162_v13  ;;  %v1099_v39 = vcombine.high %v58_v38, %v58_v38  ;;  %v1106_v40 = vrot.slane %v58_v38, %v7767_v35  ;;  %v7187_v53 = vld [vmem:[#allocation2 + $0x1f0] sm:$0xff]   ;;  %v7190_v58 = vld [vmem:[#allocation2 + $0x168] sm:$0xff]   ;;  %v7194_v62 = vld [vmem:[#allocation2 + $0x160] sm:$0xff]  }
  0x2b   :  { %v7188_v55 = vld [vmem:[#allocation2 + $0x130] sm:$0xff]   ;;  %v7191_v59 = vld [vmem:[#allocation2 + $0x1e8] sm:$0xff]   ;;  %v7195_v63 = vld [vmem:[#allocation2 + $0x1e0] sm:$0xff]  }
  0x2c   :  { %6446 = vmatpush3.bf16.msra.mxu0 %v7163_v14  ;;  %v1114_v43 = vcombine.high %v1106_v40, %v1106_v40  ;;  %v1122_v44 = vrot.slane %v1106_v40, %v7767_v35  ;;  %v7775_v45 = vrot.slane %v1099_v39, %v7767_v35  ;;  %v7189_v56 = vld [vmem:[#allocation2 + $0x1b0] sm:$0xff]   ;;  %v7192_v60 = vld [vmem:[#allocation2 + $0x128] sm:$0xff]   ;;  %v7196_v0 = vld [vmem:[#allocation2 + $0x120] sm:$0xff]  }
  0x2d   :  { %6468 = vmatpush3.bf16.msra.mxu1 %v7164_v15  ;;  %6447 = vmatprep.subr.bf16.mxu0 %v7165_v16  ;;  %v7193_v61 = vld [vmem:[#allocation2 + $0x1a8] sm:$0xff]   ;;  %v7197_v1 = vld [vmem:[#allocation2 + $0x1a0] sm:$0xff]   ;;  %v7198_v2 = vld [vmem:[#allocation2 + $0x158] sm:$0xff]  }
  0x2e   :  { %6469 = vmatprep.subr.bf16.mxu1 %v7166_v17  ;;  %v1136_v47 = vrot.slane %v1114_v43, %v7767_v35  ;;  %v1115_v49 = vcombine.high %v7775_v45, %v7775_v45  ;;  %v1144_v50 = vcombine.high %v1122_v44, %v1122_v44  ;;  %v7199_v3 = vld [vmem:[#allocation2 + $0x1d8] sm:$0xff]   ;;  %v7202_v6 = vld [vmem:[#allocation2 + $0x150] sm:$0xff]   ;;  %v7206_v10 = vld [vmem:[#allocation2 + $0x148] sm:$0xff]  }
  0x2f   :  { %v7200_v4 = vld [vmem:[#allocation2 + $0x118] sm:$0xff]   ;;  %v7203_v7 = vld [vmem:[#allocation2 + $0x1d0] sm:$0xff]   ;;  %v7207_v11 = vld [vmem:[#allocation2 + $0x1c8] sm:$0xff]  }
  0x30   :  { %6448 = vmatpush3.bf16.msra.mxu0 %v7167_v18  ;;  %4659 = vmatprep.mubr.bf16.mxu0 %v1136_v47  ;;  %v1146_v52 = vcombine.high %v1136_v47, %v1136_v47  ;;  %v1143_v54 = vrot.slane %v1115_v49, %v7767_v35  ;;  %v7201_v5 = vld [vmem:[#allocation2 + $0x198] sm:$0xff]   ;;  %v7204_v8 = vld [vmem:[#allocation2 + $0x110] sm:$0xff]   ;;  %v7208_v12 = vld [vmem:[#allocation2 + $0x108] sm:$0xff]   ;;  %v1129_v18 = vrot.slane %v7775_v45, %v7767_v35 }
  0x31   :  { %6470 = vmatpush3.bf16.msra.mxu1 %v7168_v19  ;;  %6449 = vmatprep.subr.bf16.mxu0 %v7169_v20  ;;  %v7205_v9 = vld [vmem:[#allocation2 + $0x190] sm:$0xff]   ;;  %v7209_v13 = vld [vmem:[#allocation2 + $0x188] sm:$0xff]   ;;  %v7210_v14 = vld [vmem:[#allocation2 + $0x140] sm:$0xff]  }
  0x32   :  { %6471 = vmatprep.subr.bf16.mxu1 %v7170_v21  ;;  %4699 = vmatprep.mubr.bf16.mxu1 %v1146_v52  ;;  %v1147_v57 = vcombine.high %v1143_v54, %v1143_v54  ;;  %v7211_v15 = vld [vmem:[#allocation2 + $0x1c0] sm:$0xff]   ;;  %v7214_v19 = vld [vmem:[#allocation2 + $0x278] sm:$0xff]   ;;  %v1145_v23 = vcombine.high %v1129_v18, %v1129_v18  ;;  %v7218_v24 = vld [vmem:[#allocation2 + $0x270] sm:$0xff]  }
  0x33   :  { %v7212_v16 = vld [vmem:[#allocation2 + $0x100] sm:$0xff]   ;;  %v7215_v20 = vld [vmem:[#allocation2 + $0x2f8] sm:$0xff]   ;;  %v7223_v29 = vld [vmem:[#allocation2 + $0x2e8] sm:$0xff]  }
  0x34   :  { %6450 = vmatpush3.bf16.msra.mxu0 %v7171_v25  ;;  %v7213_v17 = vld [vmem:[#allocation2 + $0x180] sm:$0xff]   ;;  %v7216_v21 = vld [vmem:[#allocation2 + $0x238] sm:$0xff]   ;;  %v7219_v25 = vld [vmem:[#allocation2 + $0x2f0] sm:$0xff]  }
  0x35   :  { %6472 = vmatpush3.bf16.msra.mxu1 %v7172_v26  ;;  %6451 = vmatprep.subr.bf16.mxu0 %v7173_v27  ;;  %v7217_v22 = vld [vmem:[#allocation2 + $0x2b8] sm:$0xff]   ;;  %v7220_v26 = vld [vmem:[#allocation2 + $0x230] sm:$0xff]   ;;  %v7224_v30 = vld [vmem:[#allocation2 + $0x228] sm:$0xff]  }
  0x36   :  { %6473 = vmatprep.subr.bf16.mxu1 %v7174_v28  ;;  %v7221_v27 = vld [vmem:[#allocation2 + $0x2b0] sm:$0xff]   ;;  %v7222_v28 = vld [vmem:[#allocation2 + $0x268] sm:$0xff]   ;;  %v7231_v38 = vld [vmem:[#allocation2 + $0x2d8] sm:$0xff]  }
  0x37   :  { %v7232_v39 = vld [vmem:[#allocation2 + $0x218] sm:$0xff]   ;;  %v7236_v43 = vld [vmem:[#allocation2 + $0x210] sm:$0xff]   ;;  %v7238_v45 = vld [vmem:[#allocation2 + $0x248] sm:$0xff]  }
  0x38   :  { %6452 = vmatpush3.bf16.msra.mxu0 %v7175_v31  ;;  %v7225_v31 = vld [vmem:[#allocation2 + $0x2a8] sm:$0xff]   ;;  %v7233_v40 = vld [vmem:[#allocation2 + $0x298] sm:$0xff]   ;;  %v7242_v49 = vld [vmem:[#allocation2 + $0x240] sm:$0xff]  }
  0x39   :  { %6474 = vmatpush3.bf16.msra.mxu1 %v7176_v32  ;;  %6453 = vmatprep.subr.bf16.mxu0 %v7177_v33  ;;  %v7226_v32 = vld [vmem:[#allocation2 + $0x260] sm:$0xff]   ;;  %v7240_v47 = vld [vmem:[#allocation2 + $0x208] sm:$0xff]  }
  0x3a   :  { %6475 = vmatprep.subr.bf16.mxu1 %v7178_v34  ;;  %v7227_v33 = vld [vmem:[#allocation2 + $0x2e0] sm:$0xff]   ;;  %v59_v52 = vld [vmem:[%s7908_s0 + $0x8] sm:$0xff] }
  0x3b   :  { %v7228_v34 = vld [vmem:[#allocation2 + $0x220] sm:$0xff]  }
  0x3c   :  { %6454 = vmatpush3.bf16.msra.mxu0 %v7179_v36  ;;  %v7229_v36 = vld [vmem:[#allocation2 + $0x2a0] sm:$0xff]  }
  0x3d   :  { %6476 = vmatpush3.bf16.msra.mxu1 %v7180_v37  ;;  %6483 = vmatprep.subr.bf16.mxu0 %v7182_v41  ;;  %v7230_v37 = vld [vmem:[#allocation2 + $0x258] sm:$0xff]   ;;  %v7234_v41 = vld [vmem:[#allocation2 + $0x250] sm:$0xff]  }
  0x3e   :  { %6505 = vmatprep.subr.bf16.mxu1 %v7183_v42  ;;  %v7235_v42 = vld [vmem:[#allocation2 + $0x2d0] sm:$0xff]  }
  0x3f   :  { %4660 = vmatmul.mubr.bf16.vlgmr.msra.gmra.mxu0 %v1122_v44  ;;  %v7237_v44 = vld [vmem:[#allocation2 + $0x290] sm:$0xff]  }
  0x40   :  { %6484 = vmatpush3.bf16.msra.mxu0 %v7184_v46  ;;  %4700 = vmatmul.mubr.bf16.vlgmr.msra.gmra.mxu1 %v1144_v50  ;;  %v7239_v46 = vld [vmem:[#allocation2 + $0x2c8] sm:$0xff]   ;;  %v7243_v50 = vld [vmem:[#allocation2 + $0x2c0] sm:$0xff]  }
  0x41   :  { %6485 = vmatprep.subr.bf16.mxu0 %v7186_v51  ;;  %6506 = vmatpush3.bf16.msra.mxu1 %v7185_v48  ;;  %v7241_v48 = vld [vmem:[#allocation2 + $0x288] sm:$0xff]   ;;  %v7244_v51 = vld [vmem:[#allocation2 + $0x200] sm:$0xff]  }
  0x42   :  { %4739 = vmatprep.mubr.bf16.mxu0 %v1143_v54  ;;  %6507 = vmatprep.subr.bf16.mxu1 %v7187_v53  ;;  %v7245_v53 = vld [vmem:[#allocation2 + $0x280] sm:$0xff]   ;;  %v1155_v54 = vrot.slane %v59_v52, %v7767_v35 }
  0x43   :  { %4779 = vmatprep.mubr.bf16.mxu1 %v1147_v57 }
  0x44   :  { %6486 = vmatpush3.bf16.msra.mxu0 %v7188_v55  ;;  %v1148_v55 = vcombine.high %v59_v52, %v59_v52  ;;  %v1163_v57 = vcombine.high %v1155_v54, %v1155_v54  ;;  %v7295_v52 = vld [vmem:[#allocation2 + $0x458] sm:$0xff]  }
  0x45   :  { %6487 = vmatprep.subr.bf16.mxu0 %v7190_v58  ;;  %6508 = vmatpush3.bf16.msra.mxu1 %v7189_v56  ;;  %v7246_v56 = vld [vmem:[#allocation2 + $0x378] sm:$0xff]   ;;  %v1171_v58 = vrot.slane %v1155_v54, %v7767_v35 }
  0x46   :  { %6509 = vmatprep.subr.bf16.mxu1 %v7191_v59  ;;  %v7247_v59 = vld [vmem:[#allocation2 + $0x3f8] sm:$0xff]  }
  0x47   :  { %v7297_v54 = vld [vmem:[#allocation2 + $0x418] sm:$0xff]  }
  0x48   :  { %6488 = vmatpush3.bf16.msra.mxu0 %v7192_v60  ;;  %v7789_v60 = vrot.slane %v1148_v55, %v7767_v35  ;;  %v7298_v55 = vld [vmem:[#allocation2 + $0x498] sm:$0xff]  }
  0x49   :  { %6489 = vmatprep.subr.bf16.mxu0 %v7194_v62  ;;  %6510 = vmatpush3.bf16.msra.mxu1 %v7193_v61  ;;  %v7248_v61 = vld [vmem:[#allocation2 + $0x338] sm:$0xff]   ;;  %v1185_v62 = vrot.slane %v1163_v57, %v7767_v35  ;;  %v7300_v57 = vld [vmem:[#allocation2 + $0x4d0] sm:$0xff]  }
  0x4a   :  { %6511 = vmatprep.subr.bf16.mxu1 %v7195_v63  ;;  %v7249_v63 = vld [vmem:[#allocation2 + $0x3b8] sm:$0xff]  }
  0x4c   :  { %6490 = vmatpush3.bf16.msra.mxu0 %v7196_v0  ;;  %v1164_v0 = vcombine.high %v7789_v60, %v7789_v60 }
  0x4d   :  { %6491 = vmatprep.subr.bf16.mxu0 %v7198_v2  ;;  %6512 = vmatpush3.bf16.msra.mxu1 %v7197_v1  ;;  %v1193_v1 = vcombine.high %v1171_v58, %v1171_v58  ;;  %v7250_v2 = vld [vmem:[#allocation2 + $0x370] sm:$0xff]  }
  0x4e   :  { %6513 = vmatprep.subr.bf16.mxu1 %v7199_v3  ;;  %v1195_v3 = vcombine.high %v1185_v62, %v1185_v62 }
  0x50   :  { %6492 = vmatpush3.bf16.msra.mxu0 %v7200_v4  ;;  %v7251_v4 = vld [vmem:[#allocation2 + $0x3f0] sm:$0xff]  }
  0x51   :  { %6493 = vmatprep.subr.bf16.mxu0 %v7202_v6  ;;  %6514 = vmatpush3.bf16.msra.mxu1 %v7201_v5  ;;  %v1192_v5 = vrot.slane %v1164_v0, %v7767_v35  ;;  %v7252_v6 = vld [vmem:[#allocation2 + $0x330] sm:$0xff]   ;;  %v7307_v0 = vld [vmem:[#allocation2 + $0x440] sm:$0xff]  }
  0x52   :  { %6515 = vmatprep.subr.bf16.mxu1 %v7203_v7  ;;  %v7253_v7 = vld [vmem:[#allocation2 + $0x3b0] sm:$0xff]  }
  0x54   :  { %6494 = vmatpush3.bf16.msra.mxu0 %v7204_v8  ;;  %v1196_v8 = vcombine.high %v1192_v5, %v1192_v5 }
  0x55   :  { %6495 = vmatprep.subr.bf16.mxu0 %v7206_v10  ;;  %6516 = vmatpush3.bf16.msra.mxu1 %v7205_v9  ;;  %v7254_v9 = vld [vmem:[#allocation2 + $0x368] sm:$0xff]  }
  0x56   :  { %6517 = vmatprep.subr.bf16.mxu1 %v7207_v11  ;;  %v7255_v10 = vld [vmem:[#allocation2 + $0x3e8] sm:$0xff]  }
  0x57   :  { %v7256_v11 = vld [vmem:[#allocation2 + $0x328] sm:$0xff]  }
  0x58   :  { %6496 = vmatpush3.bf16.msra.mxu0 %v7208_v12  ;;  %v7257_v12 = vld [vmem:[#allocation2 + $0x3a8] sm:$0xff]  }
  0x59   :  { %6497 = vmatprep.subr.bf16.mxu0 %v7210_v14  ;;  %6518 = vmatpush3.bf16.msra.mxu1 %v7209_v13  ;;  %v7258_v13 = vld [vmem:[#allocation2 + $0x360] sm:$0xff]  }
  0x5a   :  { %6519 = vmatprep.subr.bf16.mxu1 %v7211_v15  ;;  %v7259_v14 = vld [vmem:[#allocation2 + $0x3e0] sm:$0xff]  }
  0x5b   :  { %v7260_v15 = vld [vmem:[#allocation2 + $0x320] sm:$0xff]  }
  0x5c   :  { %6498 = vmatpush3.bf16.msra.mxu0 %v7212_v16  ;;  %v7261_v16 = vld [vmem:[#allocation2 + $0x3a0] sm:$0xff]  }
  0x5d   :  { %6527 = vmatprep.subr.bf16.mxu0 %v7214_v19  ;;  %6520 = vmatpush3.bf16.msra.mxu1 %v7213_v17  ;;  %v7262_v17 = vld [vmem:[#allocation2 + $0x358] sm:$0xff]  }
  0x5e   :  { %6549 = vmatprep.subr.bf16.mxu1 %v7215_v20  ;;  %v7264_v19 = vld [vmem:[#allocation2 + $0x318] sm:$0xff]  }
  0x5f   :  { %4740 = vmatmul.mubr.bf16.vlgmr.msra.gmra.mxu0 %v1129_v18  ;;  %v7263_v18 = vld [vmem:[#allocation2 + $0x3d8] sm:$0xff]  }
  0x60   :  { %6528 = vmatpush3.bf16.msra.mxu0 %v7216_v21  ;;  %4780 = vmatmul.mubr.bf16.vlgmr.msra.gmra.mxu1 %v1145_v23  ;;  %v7265_v20 = vld [vmem:[#allocation2 + $0x398] sm:$0xff]   ;;  %v7266_v21 = vld [vmem:[#allocation2 + $0x350] sm:$0xff]  }
  0x61   :  { %6529 = vmatprep.subr.bf16.mxu0 %v7218_v24  ;;  %6550 = vmatpush3.bf16.msra.mxu1 %v7217_v22  ;;  %v7267_v22 = vld [vmem:[#allocation2 + $0x3d0] sm:$0xff]  }
  0x62   :  { %6551 = vmatprep.subr.bf16.mxu1 %v7219_v25  ;;  %4819 = vmatprep.mubr.bf16.mxu0 %v1185_v62  ;;  %v7268_v23 = vld [vmem:[#allocation2 + $0x310] sm:$0xff]   ;;  %v7270_v25 = vld [vmem:[#allocation2 + $0x348] sm:$0xff]  }
  0x63   :  { %4859 = vmatprep.mubr.bf16.mxu1 %v1195_v3  ;;  %v7269_v24 = vld [vmem:[#allocation2 + $0x390] sm:$0xff]   ;;  %v7305_v62 = vld [vmem:[#allocation2 + $0x408] sm:$0xff]  }
  0x64   :  { %6530 = vmatpush3.bf16.msra.mxu0 %v7220_v26  ;;  %v7271_v26 = vld [vmem:[#allocation2 + $0x3c8] sm:$0xff]   ;;  %v60_v3 = vld [vmem:[%s7908_s0 + $0x10] sm:$0xff] }
  0x65   :  { %6531 = vmatprep.subr.bf16.mxu0 %v7222_v28  ;;  %6552 = vmatpush3.bf16.msra.mxu1 %v7221_v27  ;;  %v7272_v27 = vld [vmem:[#allocation2 + $0x308] sm:$0xff]  }
  0x66   :  { %6553 = vmatprep.subr.bf16.mxu1 %v7223_v29  ;;  %v7273_v28 = vld [vmem:[#allocation2 + $0x388] sm:$0xff]   ;;  %v7274_v29 = vld [vmem:[#allocation2 + $0x340] sm:$0xff]  }
  0x68   :  { %6532 = vmatpush3.bf16.msra.mxu0 %v7224_v30  ;;  %v7275_v30 = vld [vmem:[#allocation2 + $0x3c0] sm:$0xff]  }
  0x69   :  { %6533 = vmatprep.subr.bf16.mxu0 %v7226_v32  ;;  %6554 = vmatpush3.bf16.msra.mxu1 %v7225_v31  ;;  %v7276_v31 = vld [vmem:[#allocation2 + $0x300] sm:$0xff]  }
  0x6a   :  { %6555 = vmatprep.subr.bf16.mxu1 %v7227_v33  ;;  %v7277_v32 = vld [vmem:[#allocation2 + $0x380] sm:$0xff]   ;;  %v1178_v33 = vrot.slane %v7789_v60, %v7767_v35  ;;  %v7303_v60 = vld [vmem:[#allocation2 + $0x448] sm:$0xff]  }
  0x6c   :  { %6534 = vmatpush3.bf16.msra.mxu0 %v7228_v34  ;;  %v7279_v34 = vld [vmem:[#allocation2 + $0x478] sm:$0xff]  }
  0x6d   :  { %6535 = vmatprep.subr.bf16.mxu0 %v7230_v37  ;;  %6556 = vmatpush3.bf16.msra.mxu1 %v7229_v36  ;;  %v7280_v36 = vld [vmem:[#allocation2 + $0x4f8] sm:$0xff]  }
  0x6e   :  { %6557 = vmatprep.subr.bf16.mxu1 %v7231_v38  ;;  %v7281_v37 = vld [vmem:[#allocation2 + $0x438] sm:$0xff]  }
  0x6f   :  { %v7282_v38 = vld [vmem:[#allocation2 + $0x4b8] sm:$0xff]  }
  0x70   :  { %6536 = vmatpush3.bf16.msra.mxu0 %v7232_v39  ;;  %v1194_v39 = vcombine.high %v1178_v33, %v1178_v33 }
  0x71   :  { %6537 = vmatprep.subr.bf16.mxu0 %v7234_v41  ;;  %6558 = vmatpush3.bf16.msra.mxu1 %v7233_v40  ;;  %v7283_v40 = vld [vmem:[#allocation2 + $0x470] sm:$0xff]  }
  0x72   :  { %6559 = vmatprep.subr.bf16.mxu1 %v7235_v42  ;;  %v7284_v41 = vld [vmem:[#allocation2 + $0x4f0] sm:$0xff]  }
  0x73   :  { %v7285_v42 = vld [vmem:[#allocation2 + $0x430] sm:$0xff]  }
  0x74   :  { %6538 = vmatpush3.bf16.msra.mxu0 %v7236_v43  ;;  %v7286_v43 = vld [vmem:[#allocation2 + $0x4b0] sm:$0xff]  }
  0x75   :  { %6539 = vmatprep.subr.bf16.mxu0 %v7238_v45  ;;  %6560 = vmatpush3.bf16.msra.mxu1 %v7237_v44  ;;  %v7287_v44 = vld [vmem:[#allocation2 + $0x468] sm:$0xff]  }
  0x76   :  { %6561 = vmatprep.subr.bf16.mxu1 %v7239_v46  ;;  %v7288_v45 = vld [vmem:[#allocation2 + $0x4e8] sm:$0xff]  }
  0x77   :  { %v7289_v46 = vld [vmem:[#allocation2 + $0x428] sm:$0xff]  }
  0x78   :  { %6540 = vmatpush3.bf16.msra.mxu0 %v7240_v47  ;;  %v7290_v47 = vld [vmem:[#allocation2 + $0x4a8] sm:$0xff]  }
  0x79   :  { %6541 = vmatprep.subr.bf16.mxu0 %v7242_v49  ;;  %6562 = vmatpush3.bf16.msra.mxu1 %v7241_v48  ;;  %v7291_v48 = vld [vmem:[#allocation2 + $0x460] sm:$0xff]  }
  0x7a   :  { %6563 = vmatprep.subr.bf16.mxu1 %v7243_v50  ;;  %v7292_v49 = vld [vmem:[#allocation2 + $0x4e0] sm:$0xff]  }
  0x7b   :  { %v7293_v50 = vld [vmem:[#allocation2 + $0x420] sm:$0xff]  }
  0x7c   :  { %6542 = vmatpush3.bf16.msra.mxu0 %v7244_v51  ;;  %v7294_v51 = vld [vmem:[#allocation2 + $0x4a0] sm:$0xff]  }
  0x7d   :  { %6571 = vmatprep.subr.bf16.mxu0 %v7246_v56  ;;  %6564 = vmatpush3.bf16.msra.mxu1 %v7245_v53  ;;  %v7296_v53 = vld [vmem:[#allocation2 + $0x4d8] sm:$0xff]   ;;  %v7299_v56 = vld [vmem:[#allocation2 + $0x450] sm:$0xff]  }
  0x7e   :  { %6593 = vmatprep.subr.bf16.mxu1 %v7247_v59  ;;  %v7302_v59 = vld [vmem:[#allocation2 + $0x490] sm:$0xff]  }
  0x7f   :  { %4820 = vmatmul.mubr.bf16.vlgmr.msra.gmra.mxu0 %v1171_v58  ;;  %v7301_v58 = vld [vmem:[#allocation2 + $0x410] sm:$0xff]  }
  0x80   :  { %6572 = vmatpush3.bf16.msra.mxu0 %v7248_v61  ;;  %4860 = vmatmul.mubr.bf16.vlgmr.msra.gmra.mxu1 %v1193_v1  ;;  %v7304_v61 = vld [vmem:[#allocation2 + $0x4c8] sm:$0xff]   ;;  %v7308_v1 = vld [vmem:[#allocation2 + $0x4c0] sm:$0xff]  }
  0x81   :  { %6573 = vmatprep.subr.bf16.mxu0 %v7250_v2  ;;  %6594 = vmatpush3.bf16.msra.mxu1 %v7249_v63  ;;  %v7306_v63 = vld [vmem:[#allocation2 + $0x488] sm:$0xff]   ;;  %v7309_v2 = vld [vmem:[#allocation2 + $0x400] sm:$0xff]  }
  0x82   :  { %4899 = vmatprep.mubr.bf16.mxu0 %v1192_v5  ;;  %6595 = vmatprep.subr.bf16.mxu1 %v7251_v4  ;;  %v7310_v4 = vld [vmem:[#allocation2 + $0x480] sm:$0xff]   ;;  %v1204_v5 = vrot.slane %v60_v3, %v7767_v35 }
  0x83   :  { %4939 = vmatprep.mubr.bf16.mxu1 %v1196_v8 }
  0x84   :  { %6574 = vmatpush3.bf16.msra.mxu0 %v7252_v6  ;;  %v1197_v6 = vcombine.high %v60_v3, %v60_v3  ;;  %v1212_v8 = vcombine.high %v1204_v5, %v1204_v5  ;;  %v7360_v3 = vld [vmem:[#allocation2 + $0x658] sm:$0xff]  }
  0x85   :  { %6575 = vmatprep.subr.bf16.mxu0 %v7254_v9  ;;  %6596 = vmatpush3.bf16.msra.mxu1 %v7253_v7  ;;  %v7311_v7 = vld [vmem:[#allocation2 + $0x578] sm:$0xff]   ;;  %v1220_v9 = vrot.slane %v1204_v5, %v7767_v35 }
  0x86   :  { %6597 = vmatprep.subr.bf16.mxu1 %v7255_v10  ;;  %v7312_v10 = vld [vmem:[#allocation2 + $0x5f8] sm:$0xff]  }
  0x87   :  { %v7362_v5 = vld [vmem:[#allocation2 + $0x618] sm:$0xff]  }
  0x88   :  { %6576 = vmatpush3.bf16.msra.mxu0 %v7256_v11  ;;  %v7803_v11 = vrot.slane %v1197_v6, %v7767_v35  ;;  %v7363_v6 = vld [vmem:[#allocation2 + $0x698] sm:$0xff]  }
  0x89   :  { %6577 = vmatprep.subr.bf16.mxu0 %v7258_v13  ;;  %6598 = vmatpush3.bf16.msra.mxu1 %v7257_v12  ;;  %v7313_v12 = vld [vmem:[#allocation2 + $0x538] sm:$0xff]   ;;  %v1234_v13 = vrot.slane %v1212_v8, %v7767_v35  ;;  %v7365_v8 = vld [vmem:[#allocation2 + $0x6d0] sm:$0xff]  }
  0x8a   :  { %6599 = vmatprep.subr.bf16.mxu1 %v7259_v14  ;;  %v7314_v14 = vld [vmem:[#allocation2 + $0x5b8] sm:$0xff]  }
  0x8c   :  { %6578 = vmatpush3.bf16.msra.mxu0 %v7260_v15  ;;  %v1213_v15 = vcombine.high %v7803_v11, %v7803_v11 }
  0x8d   :  { %6579 = vmatprep.subr.bf16.mxu0 %v7262_v17  ;;  %6600 = vmatpush3.bf16.msra.mxu1 %v7261_v16  ;;  %v1242_v16 = vcombine.high %v1220_v9, %v1220_v9  ;;  %v7315_v17 = vld [vmem:[#allocation2 + $0x570] sm:$0xff]  }
  0x8e   :  { %6601 = vmatprep.subr.bf16.mxu1 %v7263_v18  ;;  %v1244_v18 = vcombine.high %v1234_v13, %v1234_v13 }
  0x90   :  { %6580 = vmatpush3.bf16.msra.mxu0 %v7264_v19  ;;  %v7316_v19 = vld [vmem:[#allocation2 + $0x5f0] sm:$0xff]  }
  0x91   :  { %6581 = vmatprep.subr.bf16.mxu0 %v7266_v21  ;;  %6602 = vmatpush3.bf16.msra.mxu1 %v7265_v20  ;;  %v1241_v20 = vrot.slane %v1213_v15, %v7767_v35  ;;  %v7317_v21 = vld [vmem:[#allocation2 + $0x530] sm:$0xff]   ;;  %v7372_v15 = vld [vmem:[#allocation2 + $0x640] sm:$0xff]  }
  0x92   :  { %6603 = vmatprep.subr.bf16.mxu1 %v7267_v22  ;;  %v7318_v22 = vld [vmem:[#allocation2 + $0x5b0] sm:$0xff]  }
  0x94   :  { %6582 = vmatpush3.bf16.msra.mxu0 %v7268_v23  ;;  %v1245_v23 = vcombine.high %v1241_v20, %v1241_v20 }
  0x95   :  { %6583 = vmatprep.subr.bf16.mxu0 %v7270_v25  ;;  %6604 = vmatpush3.bf16.msra.mxu1 %v7269_v24  ;;  %v7319_v24 = vld [vmem:[#allocation2 + $0x568] sm:$0xff]  }
  0x96   :  { %6605 = vmatprep.subr.bf16.mxu1 %v7271_v26  ;;  %v7320_v25 = vld [vmem:[#allocation2 + $0x5e8] sm:$0xff]  }
  0x97   :  { %v7321_v26 = vld [vmem:[#allocation2 + $0x528] sm:$0xff]  }
  0x98   :  { %6584 = vmatpush3.bf16.msra.mxu0 %v7272_v27  ;;  %v7322_v27 = vld [vmem:[#allocation2 + $0x5a8] sm:$0xff]  }
  0x99   :  { %6585 = vmatprep.subr.bf16.mxu0 %v7274_v29  ;;  %6606 = vmatpush3.bf16.msra.mxu1 %v7273_v28  ;;  %v7323_v28 = vld [vmem:[#allocation2 + $0x560] sm:$0xff]  }
  0x9a   :  { %6607 = vmatprep.subr.bf16.mxu1 %v7275_v30  ;;  %v7324_v29 = vld [vmem:[#allocation2 + $0x5e0] sm:$0xff]  }
  0x9b   :  { %v7325_v30 = vld [vmem:[#allocation2 + $0x520] sm:$0xff]  }
  0x9c   :  { %6586 = vmatpush3.bf16.msra.mxu0 %v7276_v31  ;;  %v7326_v31 = vld [vmem:[#allocation2 + $0x5a0] sm:$0xff]  }
  0x9d   :  { %6615 = vmatprep.subr.bf16.mxu0 %v7279_v34  ;;  %6608 = vmatpush3.bf16.msra.mxu1 %v7277_v32  ;;  %v7327_v32 = vld [vmem:[#allocation2 + $0x558] sm:$0xff]  }
  0x9e   :  { %6637 = vmatprep.subr.bf16.mxu1 %v7280_v36  ;;  %v7329_v34 = vld [vmem:[#allocation2 + $0x518] sm:$0xff]  }
  0x9f   :  { %4900 = vmatmul.mubr.bf16.vlgmr.msra.gmra.mxu0 %v1178_v33  ;;  %v7328_v33 = vld [vmem:[#allocation2 + $0x5d8] sm:$0xff]  }
  0xa0   :  { %6616 = vmatpush3.bf16.msra.mxu0 %v7281_v37  ;;  %4940 = vmatmul.mubr.bf16.vlgmr.msra.gmra.mxu1 %v1194_v39  ;;  %v7330_v36 = vld [vmem:[#allocation2 + $0x598] sm:$0xff]   ;;  %v7331_v37 = vld [vmem:[#allocation2 + $0x550] sm:$0xff]  }
  0xa1   :  { %6617 = vmatprep.subr.bf16.mxu0 %v7283_v40  ;;  %6638 = vmatpush3.bf16.msra.mxu1 %v7282_v38  ;;  %v7332_v38 = vld [vmem:[#allocation2 + $0x5d0] sm:$0xff]  }
  0xa2   :  { %6639 = vmatprep.subr.bf16.mxu1 %v7284_v41  ;;  %4979 = vmatprep.mubr.bf16.mxu0 %v1234_v13  ;;  %v7333_v39 = vld [vmem:[#allocation2 + $0x510] sm:$0xff]   ;;  %v7335_v41 = vld [vmem:[#allocation2 + $0x548] sm:$0xff]  }
  0xa3   :  { %5019 = vmatprep.mubr.bf16.mxu1 %v1244_v18  ;;  %v7334_v40 = vld [vmem:[#allocation2 + $0x590] sm:$0xff]   ;;  %v7370_v13 = vld [vmem:[#allocation2 + $0x608] sm:$0xff]   ;;  %v61_v18 = vld [vmem:[%s7908_s0 + $0x18] sm:$0xff] }
  0xa4   :  { %6618 = vmatpush3.bf16.msra.mxu0 %v7285_v42  ;;  %v7336_v42 = vld [vmem:[#allocation2 + $0x5c8] sm:$0xff]  }
  0xa5   :  { %6619 = vmatprep.subr.bf16.mxu0 %v7287_v44  ;;  %6640 = vmatpush3.bf16.msra.mxu1 %v7286_v43  ;;  %v7337_v43 = vld [vmem:[#allocation2 + $0x508] sm:$0xff]  }
  0xa6   :  { %6641 = vmatprep.subr.bf16.mxu1 %v7288_v45  ;;  %v7338_v44 = vld [vmem:[#allocation2 + $0x588] sm:$0xff]   ;;  %v7339_v45 = vld [vmem:[#allocation2 + $0x540] sm:$0xff]  }
  0xa8   :  { %6620 = vmatpush3.bf16.msra.mxu0 %v7289_v46  ;;  %v7340_v46 = vld [vmem:[#allocation2 + $0x5c0] sm:$0xff]  }
  0xa9   :  { %6621 = vmatprep.subr.bf16.mxu0 %v7291_v48  ;;  %6642 = vmatpush3.bf16.msra.mxu1 %v7290_v47  ;;  %v7341_v47 = vld [vmem:[#allocation2 + $0x500] sm:$0xff]  }
  0xaa   :  { %6643 = vmatprep.subr.bf16.mxu1 %v7292_v49  ;;  %v7342_v48 = vld [vmem:[#allocation2 + $0x580] sm:$0xff]   ;;  %v1227_v49 = vrot.slane %v7803_v11, %v7767_v35  ;;  %v7368_v11 = vld [vmem:[#allocation2 + $0x648] sm:$0xff]  }
  0xac   :  { %6622 = vmatpush3.bf16.msra.mxu0 %v7293_v50  ;;  %v7344_v50 = vld [vmem:[#allocation2 + $0x678] sm:$0xff]  }
  0xad   :  { %6623 = vmatprep.subr.bf16.mxu0 %v7295_v52  ;;  %6644 = vmatpush3.bf16.msra.mxu1 %v7294_v51  ;;  %v7345_v51 = vld [vmem:[#allocation2 + $0x6f8] sm:$0xff]  }
  0xae   :  { %6645 = vmatprep.subr.bf16.mxu1 %v7296_v53  ;;  %v7346_v52 = vld [vmem:[#allocation2 + $0x638] sm:$0xff]  }
  0xaf   :  { %v7347_v53 = vld [vmem:[#allocation2 + $0x6b8] sm:$0xff]  }
  0xb0   :  { %6624 = vmatpush3.bf16.msra.mxu0 %v7297_v54  ;;  %v1243_v54 = vcombine.high %v1227_v49, %v1227_v49 }
  0xb1   :  { %6625 = vmatprep.subr.bf16.mxu0 %v7299_v56  ;;  %6646 = vmatpush3.bf16.msra.mxu1 %v7298_v55  ;;  %v7348_v55 = vld [vmem:[#allocation2 + $0x670] sm:$0xff]  }
  0xb2   :  { %6647 = vmatprep.subr.bf16.mxu1 %v7300_v57  ;;  %v7349_v56 = vld [vmem:[#allocation2 + $0x6f0] sm:$0xff]  }
  0xb3   :  { %v7350_v57 = vld [vmem:[#allocation2 + $0x630] sm:$0xff]  }
  0xb4   :  { %6626 = vmatpush3.bf16.msra.mxu0 %v7301_v58  ;;  %v7351_v58 = vld [vmem:[#allocation2 + $0x6b0] sm:$0xff]  }
  0xb5   :  { %6627 = vmatprep.subr.bf16.mxu0 %v7303_v60  ;;  %6648 = vmatpush3.bf16.msra.mxu1 %v7302_v59  ;;  %v7352_v59 = vld [vmem:[#allocation2 + $0x668] sm:$0xff]  }
  0xb6   :  { %6649 = vmatprep.subr.bf16.mxu1 %v7304_v61  ;;  %v7353_v60 = vld [vmem:[#allocation2 + $0x6e8] sm:$0xff]  }
  0xb7   :  { %v7354_v61 = vld [vmem:[#allocation2 + $0x628] sm:$0xff]  }
  0xb8   :  { %6628 = vmatpush3.bf16.msra.mxu0 %v7305_v62  ;;  %v7355_v62 = vld [vmem:[#allocation2 + $0x6a8] sm:$0xff]  }
  0xb9   :  { %6629 = vmatprep.subr.bf16.mxu0 %v7307_v0  ;;  %6650 = vmatpush3.bf16.msra.mxu1 %v7306_v63  ;;  %v7356_v63 = vld [vmem:[#allocation2 + $0x660] sm:$0xff]  }
  0xba   :  { %6651 = vmatprep.subr.bf16.mxu1 %v7308_v1  ;;  %v7357_v0 = vld [vmem:[#allocation2 + $0x6e0] sm:$0xff]  }
  0xbb   :  { %v7358_v1 = vld [vmem:[#allocation2 + $0x620] sm:$0xff]  }
  0xbc   :  { %6630 = vmatpush3.bf16.msra.mxu0 %v7309_v2  ;;  %v7359_v2 = vld [vmem:[#allocation2 + $0x6a0] sm:$0xff]  }
  0xbd   :  { %6659 = vmatprep.subr.bf16.mxu0 %v7311_v7  ;;  %6652 = vmatpush3.bf16.msra.mxu1 %v7310_v4  ;;  %v7361_v4 = vld [vmem:[#allocation2 + $0x6d8] sm:$0xff]   ;;  %v7364_v7 = vld [vmem:[#allocation2 + $0x650] sm:$0xff]  }
  0xbe   :  { %6681 = vmatprep.subr.bf16.mxu1 %v7312_v10  ;;  %v7367_v10 = vld [vmem:[#allocation2 + $0x690] sm:$0xff]  }
  0xbf   :  { %4980 = vmatmul.mubr.bf16.vlgmr.msra.gmra.mxu0 %v1220_v9  ;;  %v7366_v9 = vld [vmem:[#allocation2 + $0x610] sm:$0xff]  }
  0xc0   :  { %6660 = vmatpush3.bf16.msra.mxu0 %v7313_v12  ;;  %5020 = vmatmul.mubr.bf16.vlgmr.msra.gmra.mxu1 %v1242_v16  ;;  %v7369_v12 = vld [vmem:[#allocation2 + $0x6c8] sm:$0xff]   ;;  %v7373_v16 = vld [vmem:[#allocation2 + $0x6c0] sm:$0xff]  }
  0xc1   :  { %6661 = vmatprep.subr.bf16.mxu0 %v7315_v17  ;;  %6682 = vmatpush3.bf16.msra.mxu1 %v7314_v14  ;;  %v7371_v14 = vld [vmem:[#allocation2 + $0x688] sm:$0xff]   ;;  %v7374_v17 = vld [vmem:[#allocation2 + $0x600] sm:$0xff]  }
  0xc2   :  { %5059 = vmatprep.mubr.bf16.mxu0 %v1241_v20  ;;  %6683 = vmatprep.subr.bf16.mxu1 %v7316_v19  ;;  %v1253_v19 = vrot.slane %v61_v18, %v7767_v35  ;;  %v7376_v20 = vld [vmem:[#allocation2 + $0x778] sm:$0xff]  }
  0xc3   :  { %5099 = vmatprep.mubr.bf16.mxu1 %v1245_v23 }
  0xc4   :  { %6662 = vmatpush3.bf16.msra.mxu0 %v7317_v21  ;;  %v1246_v21 = vcombine.high %v61_v18, %v61_v18  ;;  %v1261_v23 = vcombine.high %v1253_v19, %v1253_v19 }
  0xc5   :  { %6663 = vmatprep.subr.bf16.mxu0 %v7319_v24  ;;  %6684 = vmatpush3.bf16.msra.mxu1 %v7318_v22  ;;  %v7375_v22 = vld [vmem:[#allocation2 + $0x680] sm:$0xff]   ;;  %v1269_v24 = vrot.slane %v1253_v19, %v7767_v35  ;;  %v7414_v19 = vld [vmem:[#allocation2 + $0x8f0] sm:$0xff]  }
  0xc6   :  { %6685 = vmatprep.subr.bf16.mxu1 %v7320_v25  ;;  %v7377_v25 = vld [vmem:[#allocation2 + $0x7f8] sm:$0xff]  }
  0xc8   :  { %6664 = vmatpush3.bf16.msra.mxu0 %v7321_v26  ;;  %v7817_v26 = vrot.slane %v1246_v21, %v7767_v35 }
  0xc9   :  { %6665 = vmatprep.subr.bf16.mxu0 %v7323_v28  ;;  %6686 = vmatpush3.bf16.msra.mxu1 %v7322_v27  ;;  %v7378_v27 = vld [vmem:[#allocation2 + $0x738] sm:$0xff]   ;;  %v1283_v28 = vrot.slane %v1261_v23, %v7767_v35  ;;  %v7416_v23 = vld [vmem:[#allocation2 + $0x8b0] sm:$0xff]  }
  0xca   :  { %6687 = vmatprep.subr.bf16.mxu1 %v7324_v29  ;;  %v7379_v29 = vld [vmem:[#allocation2 + $0x7b8] sm:$0xff]  }
  0xcc   :  { %6666 = vmatpush3.bf16.msra.mxu0 %v7325_v30  ;;  %v1262_v30 = vcombine.high %v7817_v26, %v7817_v26 }
  0xcd   :  { %6667 = vmatprep.subr.bf16.mxu0 %v7327_v32  ;;  %6688 = vmatpush3.bf16.msra.mxu1 %v7326_v31  ;;  %v1291_v31 = vcombine.high %v1269_v24, %v1269_v24  ;;  %v7380_v32 = vld [vmem:[#allocation2 + $0x770] sm:$0xff]  }
  0xce   :  { %6689 = vmatprep.subr.bf16.mxu1 %v7328_v33  ;;  %v1293_v33 = vcombine.high %v1283_v28, %v1283_v28 }
  0xd0   :  { %6668 = vmatpush3.bf16.msra.mxu0 %v7329_v34 }
  0xd1   :  { %6669 = vmatprep.subr.bf16.mxu0 %v7331_v37  ;;  %6690 = vmatpush3.bf16.msra.mxu1 %v7330_v36  ;;  %v7381_v36 = vld [vmem:[#allocation2 + $0x7f0] sm:$0xff]   ;;  %v1290_v37 = vrot.slane %v1262_v30, %v7767_v35 }
  0xd2   :  { %6691 = vmatprep.subr.bf16.mxu1 %v7332_v38  ;;  %v7382_v38 = vld [vmem:[#allocation2 + $0x730] sm:$0xff]  }
  0xd4   :  { %6670 = vmatpush3.bf16.msra.mxu0 %v7333_v39 }
  0xd5   :  { %6671 = vmatprep.subr.bf16.mxu0 %v7335_v41  ;;  %6692 = vmatpush3.bf16.msra.mxu1 %v7334_v40  ;;  %v7383_v41 = vld [vmem:[#allocation2 + $0x7b0] sm:$0xff]  }
  0xd6   :  { %6693 = vmatprep.subr.bf16.mxu1 %v7336_v42  ;;  %v1294_v42 = vcombine.high %v1290_v37, %v1290_v37 }
  0xd8   :  { %6672 = vmatpush3.bf16.msra.mxu0 %v7337_v43 }
  0xd9   :  { %6673 = vmatprep.subr.bf16.mxu0 %v7339_v45  ;;  %6694 = vmatpush3.bf16.msra.mxu1 %v7338_v44  ;;  %v7384_v44 = vld [vmem:[#allocation2 + $0x768] sm:$0xff]  }
  0xda   :  { %6695 = vmatprep.subr.bf16.mxu1 %v7340_v46 }
  0xdc   :  { %6674 = vmatpush3.bf16.msra.mxu0 %v7341_v47  ;;  %v7385_v47 = vld [vmem:[#allocation2 + $0x7e8] sm:$0xff]  }
  0xdd   :  { %6703 = vmatprep.subr.bf16.mxu0 %v7344_v50  ;;  %6696 = vmatpush3.bf16.msra.mxu1 %v7342_v48 }
  0xde   :  { %6725 = vmatprep.subr.bf16.mxu1 %v7345_v51 }
  0xdf   :  { %5060 = vmatmul.mubr.bf16.vlgmr.msra.gmra.mxu0 %v1227_v49  ;;  %v7386_v49 = vld [vmem:[#allocation2 + $0x728] sm:$0xff]  }
  0xe0   :  { %6704 = vmatpush3.bf16.msra.mxu0 %v7346_v52  ;;  %5100 = vmatmul.mubr.bf16.vlgmr.msra.gmra.mxu1 %v1243_v54  ;;  %v7387_v52 = vld [vmem:[#allocation2 + $0x7a8] sm:$0xff]   ;;  %v7388_v54 = vld [vmem:[#allocation2 + $0x760] sm:$0xff]  }
  0xe1   :  { %6705 = vmatprep.subr.bf16.mxu0 %v7348_v55  ;;  %6726 = vmatpush3.bf16.msra.mxu1 %v7347_v53 }
  0xe2   :  { %6727 = vmatprep.subr.bf16.mxu1 %v7349_v56  ;;  %5139 = vmatprep.mubr.bf16.mxu0 %v1283_v28  ;;  %v7389_v56 = vld [vmem:[#allocation2 + $0x7e0] sm:$0xff]   ;;  %v7418_v28 = vld [vmem:[#allocation2 + $0x8e8] sm:$0xff]  }
  0xe3   :  { %5179 = vmatprep.mubr.bf16.mxu1 %v1293_v33 }
  0xe4   :  { %6706 = vmatpush3.bf16.msra.mxu0 %v7350_v57  ;;  %v7390_v57 = vld [vmem:[#allocation2 + $0x720] sm:$0xff]  }
  0xe5   :  { %6707 = vmatprep.subr.bf16.mxu0 %v7352_v59  ;;  %6728 = vmatpush3.bf16.msra.mxu1 %v7351_v58  ;;  %v7391_v58 = vld [vmem:[#allocation2 + $0x7a0] sm:$0xff]   ;;  %v7392_v59 = vld [vmem:[#allocation2 + $0x758] sm:$0xff]  }
  0xe6   :  { %6729 = vmatprep.subr.bf16.mxu1 %v7353_v60  ;;  %v7393_v60 = vld [vmem:[#allocation2 + $0x7d8] sm:$0xff]  }
  0xe8   :  { %6708 = vmatpush3.bf16.msra.mxu0 %v7354_v61  ;;  %v7394_v61 = vld [vmem:[#allocation2 + $0x718] sm:$0xff]  }
  0xe9   :  { %6709 = vmatprep.subr.bf16.mxu0 %v7356_v63  ;;  %6730 = vmatpush3.bf16.msra.mxu1 %v7355_v62  ;;  %v7395_v62 = vld [vmem:[#allocation2 + $0x798] sm:$0xff]   ;;  %v7396_v63 = vld [vmem:[#allocation2 + $0x750] sm:$0xff]  }
  0xea   :  { %6731 = vmatprep.subr.bf16.mxu1 %v7357_v0  ;;  %v7397_v0 = vld [vmem:[#allocation2 + $0x7d0] sm:$0xff]  }
  0xec   :  { %6710 = vmatpush3.bf16.msra.mxu0 %v7358_v1  ;;  %v7398_v1 = vld [vmem:[#allocation2 + $0x710] sm:$0xff]  }
  0xed   :  { %6711 = vmatprep.subr.bf16.mxu0 %v7360_v3  ;;  %6732 = vmatpush3.bf16.msra.mxu1 %v7359_v2  ;;  %v7399_v2 = vld [vmem:[#allocation2 + $0x790] sm:$0xff]   ;;  %v7400_v3 = vld [vmem:[#allocation2 + $0x748] sm:$0xff]  }
  0xee   :  { %6733 = vmatprep.subr.bf16.mxu1 %v7361_v4  ;;  %v7401_v4 = vld [vmem:[#allocation2 + $0x7c8] sm:$0xff]  }
  0xf0   :  { %6712 = vmatpush3.bf16.msra.mxu0 %v7362_v5  ;;  %v7402_v5 = vld [vmem:[#allocation2 + $0x708] sm:$0xff]  }
  0xf1   :  { %6713 = vmatprep.subr.bf16.mxu0 %v7364_v7  ;;  %6734 = vmatpush3.bf16.msra.mxu1 %v7363_v6  ;;  %v7403_v6 = vld [vmem:[#allocation2 + $0x788] sm:$0xff]   ;;  %v7404_v7 = vld [vmem:[#allocation2 + $0x740] sm:$0xff]  }
  0xf2   :  { %6735 = vmatprep.subr.bf16.mxu1 %v7365_v8  ;;  %v7405_v8 = vld [vmem:[#allocation2 + $0x7c0] sm:$0xff]  }
  0xf4   :  { %6714 = vmatpush3.bf16.msra.mxu0 %v7366_v9  ;;  %v7406_v9 = vld [vmem:[#allocation2 + $0x700] sm:$0xff]  }
  0xf5   :  { %6715 = vmatprep.subr.bf16.mxu0 %v7368_v11  ;;  %6736 = vmatpush3.bf16.msra.mxu1 %v7367_v10  ;;  %v7407_v10 = vld [vmem:[#allocation2 + $0x780] sm:$0xff]   ;;  %v1276_v11 = vrot.slane %v7817_v26, %v7767_v35 }
  0xf6   :  { %6737 = vmatprep.subr.bf16.mxu1 %v7369_v12  ;;  %v7409_v12 = vld [vmem:[#allocation2 + $0x878] sm:$0xff]  }
  0xf8   :  { %6716 = vmatpush3.bf16.msra.mxu0 %v7370_v13  ;;  %v7410_v13 = vld [vmem:[#allocation2 + $0x8f8] sm:$0xff]  }
  0xf9   :  { %6717 = vmatprep.subr.bf16.mxu0 %v7372_v15  ;;  %6738 = vmatpush3.bf16.msra.mxu1 %v7371_v14  ;;  %v7411_v14 = vld [vmem:[#allocation2 + $0x838] sm:$0xff]  }
  0xfa   :  { %6739 = vmatprep.subr.bf16.mxu1 %v7373_v16  ;;  %v7412_v15 = vld [vmem:[#allocation2 + $0x8b8] sm:$0xff]   ;;  %v1292_v16 = vcombine.high %v1276_v11, %v1276_v11 }
  0xfc   :  { %6718 = vmatpush3.bf16.msra.mxu0 %v7374_v17  ;;  %v7413_v17 = vld [vmem:[#allocation2 + $0x870] sm:$0xff]  }
  0xfd   :  { %6747 = vmatprep.subr.bf16.mxu0 %v7376_v20  ;;  %6740 = vmatpush3.bf16.msra.mxu1 %v7375_v22  ;;  %v7415_v20 = vld [vmem:[#allocation2 + $0x830] sm:$0xff]  }
  0xfe   :  { %6769 = vmatprep.subr.bf16.mxu1 %v7377_v25  ;;  %v7417_v25 = vld [vmem:[#allocation2 + $0x868] sm:$0xff]  }
  0xff   :  { %v6455_v34 = vpop.f32.mrf.mxu0  ;;  %5140 = vmatmul.mubr.bf16.vlgmr.msra.gmra.mxu0 %v1269_v24 }
 0x100   :  { %v6477_v39 = vpop.f32.mrf.mxu1  ;;  %6748 = vmatpush3.bf16.msra.mxu0 %v7378_v27  ;;  %5180 = vmatmul.mubr.bf16.vlgmr.msra.gmra.mxu1 %v1291_v31  ;;  %v7419_v31 = vld [vmem:[#allocation2 + $0x828] sm:$0xff]  }
 0x101   :  { %v6456_v40 = vpop.f32.mrf.mxu0  ;;  %6749 = vmatprep.subr.bf16.mxu0 %v7380_v32  ;;  %6770 = vmatpush3.bf16.msra.mxu1 %v7379_v29 }
 0x102   :  { %v6457_v43 = vadd.f32 %v6456_v40, %v6455_v34  ;;  %v6478_v45 = vpop.f32.mrf.mxu1  ;;  %5219 = vmatprep.mubr.bf16.mxu0 %v1290_v37  ;;  %6771 = vmatprep.subr.bf16.mxu1 %v7381_v36  ;;  %v7420_v34 = vld [vmem:[#allocation2 + $0x8a8] sm:$0xff]   ;;  %v7421_v37 = vld [vmem:[#allocation2 + $0x860] sm:$0xff]  }
 0x103   :  { %v6458_v46 = vpop.f32.mrf.mxu0  ;;  %v6479_v48 = vadd.f32 %v6478_v45, %v6477_v39  ;;  %5259 = vmatprep.mubr.bf16.mxu1 %v1294_v42  ;;  %v7422_v39 = vld [vmem:[#allocation2 + $0x8e0] sm:$0xff]   ;;  %v7425_v42 = vld [vmem:[#allocation2 + $0x858] sm:$0xff]  }
 0x104   :  { %v6480_v50 = vpop.f32.mrf.mxu1  ;;  %6750 = vmatpush3.bf16.msra.mxu0 %v7382_v38  ;;  %v7423_v40 = vld [vmem:[#allocation2 + $0x820] sm:$0xff]   ;;  %v7428_v45 = vld [vmem:[#allocation2 + $0x898] sm:$0xff]   ;;  %v7429_v46 = vld [vmem:[#allocation2 + $0x850] sm:$0xff]  }
 0x105   :  { %v6459_v51 = vpop.f32.mrf.mxu0  ;;  %v7823_v53 = vadd.f32 %v6479_v48, %v6457_v43  ;;  %6751 = vmatprep.subr.bf16.mxu0 %v7384_v44  ;;  %6772 = vmatpush3.bf16.msra.mxu1 %v7383_v41  ;;  %v7424_v41 = vld [vmem:[#allocation2 + $0x8a0] sm:$0xff]   ;;  %v7426_v43 = vld [vmem:[#allocation2 + $0x8d8] sm:$0xff]   ;;  %v7431_v48 = vld [vmem:[#allocation2 + $0x810] sm:$0xff]  }
 0x106   :  { %v6481_v55 = vpop.f32.mrf.mxu1  ;;  %6773 = vmatprep.subr.bf16.mxu1 %v7385_v47  ;;  %v7427_v44 = vld [vmem:[#allocation2 + $0x818] sm:$0xff]   ;;  %v7430_v47 = vld [vmem:[#allocation2 + $0x8d0] sm:$0xff]   ;;  %v7433_v50 = vld [vmem:[#allocation2 + $0x848] sm:$0xff]  }
 0x107   :  { %v7434_v51 = vld [vmem:[#allocation2 + $0x8c8] sm:$0xff]   ;;  %v7438_v55 = vld [vmem:[#allocation2 + $0x8c0] sm:$0xff]  }
 0x108   :  { %6752 = vmatpush3.bf16.msra.mxu0 %v7386_v49  ;;  %v7432_v49 = vld [vmem:[#allocation2 + $0x890] sm:$0xff]  }
 0x109   :  { %6753 = vmatprep.subr.bf16.mxu0 %v7388_v54  ;;  %6774 = vmatpush3.bf16.msra.mxu1 %v7387_v52  ;;  %v7435_v52 = vld [vmem:[#allocation2 + $0x808] sm:$0xff]   ;;  %v7437_v54 = vld [vmem:[#allocation2 + $0x840] sm:$0xff]  }
 0x10a   :  { %6775 = vmatprep.subr.bf16.mxu1 %v7389_v56  ;;  %v7439_v56 = vld [vmem:[#allocation2 + $0x800] sm:$0xff]  }
 0x10c   :  { %6754 = vmatpush3.bf16.msra.mxu0 %v7390_v57  ;;  %v62_v57 = vld [vmem:[%s7908_s0 + $0x20] sm:$0xff] }
 0x10d   :  { %6755 = vmatprep.subr.bf16.mxu0 %v7392_v59  ;;  %6776 = vmatpush3.bf16.msra.mxu1 %v7391_v58  ;;  %v7440_v58 = vld [vmem:[#allocation2 + $0x880] sm:$0xff]   ;;  %v1302_v59 = vrot.slane %v62_v57, %v7767_v35 }
 0x10e   :  { %6777 = vmatprep.subr.bf16.mxu1 %v7393_v60  ;;  %v1295_v60 = vcombine.high %v62_v57, %v62_v57  ;;  %v7478_v57 = vld [vmem:[#allocation2 + $0xa70] sm:$0xff]  }
 0x110   :  { %6756 = vmatpush3.bf16.msra.mxu0 %v7394_v61  ;;  %v7441_v61 = vld [vmem:[#allocation2 + $0x978] sm:$0xff]  }
 0x111   :  { %6757 = vmatprep.subr.bf16.mxu0 %v7396_v63  ;;  %6778 = vmatpush3.bf16.msra.mxu1 %v7395_v62  ;;  %v1310_v62 = vcombine.high %v1302_v59, %v1302_v59  ;;  %v1318_v63 = vrot.slane %v1302_v59, %v7767_v35  ;;  %v7479_v59 = vld [vmem:[#allocation2 + $0xaf0] sm:$0xff]  }
 0x112   :  { %6779 = vmatprep.subr.bf16.mxu1 %v7397_v0  ;;  %v7442_v0 = vld [vmem:[#allocation2 + $0x9f8] sm:$0xff]  }
 0x114   :  { %6758 = vmatpush3.bf16.msra.mxu0 %v7398_v1  ;;  %v7836_v1 = vrot.slane %v1295_v60, %v7767_v35  ;;  %v7480_v60 = vld [vmem:[#allocation2 + $0xa30] sm:$0xff]  }
 0x115   :  { %6759 = vmatprep.subr.bf16.mxu0 %v7400_v3  ;;  %6780 = vmatpush3.bf16.msra.mxu1 %v7399_v2  ;;  %v7443_v2 = vld [vmem:[#allocation2 + $0x938] sm:$0xff]   ;;  %v1332_v3 = vrot.slane %v1310_v62, %v7767_v35 }
 0x116   :  { %6781 = vmatprep.subr.bf16.mxu1 %v7401_v4  ;;  %v7444_v4 = vld [vmem:[#allocation2 + $0x9b8] sm:$0xff]  }
 0x118   :  { %6760 = vmatpush3.bf16.msra.mxu0 %v7402_v5  ;;  %v1311_v5 = vcombine.high %v7836_v1, %v7836_v1 }
 0x119   :  { %6761 = vmatprep.subr.bf16.mxu0 %v7404_v7  ;;  %6782 = vmatpush3.bf16.msra.mxu1 %v7403_v6  ;;  %v1340_v6 = vcombine.high %v1318_v63, %v1318_v63  ;;  %v7445_v7 = vld [vmem:[#allocation2 + $0x970] sm:$0xff]  }
 0x11a   :  { %6783 = vmatprep.subr.bf16.mxu1 %v7405_v8  ;;  %v1342_v8 = vcombine.high %v1332_v3, %v1332_v3 }
 0x11c   :  { %6762 = vmatpush3.bf16.msra.mxu0 %v7406_v9 }
 0x11d   :  { %6791 = vmatprep.subr.bf16.mxu0 %v7409_v12  ;;  %6784 = vmatpush3.bf16.msra.mxu1 %v7407_v10  ;;  %v7446_v10 = vld [vmem:[#allocation2 + $0x9f0] sm:$0xff]  }
 0x11e   :  { %6813 = vmatprep.subr.bf16.mxu1 %v7410_v13  ;;  %v7447_v12 = vld [vmem:[#allocation2 + $0x930] sm:$0xff]  }
 0x11f   :  { %v6499_v18 = vpop.f32.mrf.mxu0  ;;  %5220 = vmatmul.mubr.bf16.vlgmr.msra.gmra.mxu0 %v1276_v11  ;;  %v1339_v11 = vrot.slane %v1311_v5, %v7767_v35 }
 0x120   :  { %v6521_v21 = vpop.f32.mrf.mxu1  ;;  %6792 = vmatpush3.bf16.msra.mxu0 %v7411_v14  ;;  %5260 = vmatmul.mubr.bf16.vlgmr.msra.gmra.mxu1 %v1292_v16 }
 0x121   :  { %v6500_v22 = vpop.f32.mrf.mxu0  ;;  %6793 = vmatprep.subr.bf16.mxu0 %v7413_v17  ;;  %6814 = vmatpush3.bf16.msra.mxu1 %v7412_v15  ;;  %v7448_v15 = vld [vmem:[#allocation2 + $0x9b0] sm:$0xff]   ;;  %v1343_v16 = vcombine.high %v1339_v11, %v1339_v11 }
 0x122   :  { %v6501_v24 = vadd.f32 %v6500_v22, %v6499_v18  ;;  %v6522_v26 = vpop.f32.mrf.mxu1  ;;  %6815 = vmatprep.subr.bf16.mxu1 %v7414_v19  ;;  %5299 = vmatprep.mubr.bf16.mxu0 %v1332_v3  ;;  %v7449_v18 = vld [vmem:[#allocation2 + $0x968] sm:$0xff]  }
 0x123   :  { %v6502_v27 = vpop.f32.mrf.mxu0  ;;  %v6523_v30 = vadd.f32 %v6522_v26, %v6521_v21  ;;  %5339 = vmatprep.mubr.bf16.mxu1 %v1342_v8  ;;  %v7450_v21 = vld [vmem:[#allocation2 + $0x9e8] sm:$0xff]  }
 0x124   :  { %v4742_v29 = vadd.f32 %v6501_v24, %v7823_v53  ;;  %v6524_v32 = vpop.f32.mrf.mxu1  ;;  %6794 = vmatpush3.bf16.msra.mxu0 %v7415_v20  ;;  %v7436_v53 = vld [vmem:[#allocation2 + $0x888] sm:$0xff]  }
 0x125   :  { %v6503_v33 = vpop.f32.mrf.mxu0  ;;  %6795 = vmatprep.subr.bf16.mxu0 %v7417_v25  ;;  %6816 = vmatpush3.bf16.msra.mxu1 %v7416_v23  ;;  %v7451_v24 = vld [vmem:[#allocation2 + $0x928] sm:$0xff]   ;;  %v7455_v32 = vld [vmem:[#allocation2 + $0x920] sm:$0xff]  }
 0x126   :  { %v7828_v36 = vadd.f32 %v6523_v30, %v4742_v29  ;;  %v6525_v38 = vpop.f32.mrf.mxu1  ;;  %6817 = vmatprep.subr.bf16.mxu1 %v7418_v28  ;;  %v7452_v27 = vld [vmem:[#allocation2 + $0x9a8] sm:$0xff]   ;;  %v7453_v29 = vld [vmem:[#allocation2 + $0x960] sm:$0xff]  }
 0x127   :  { %v7456_v33 = vld [vmem:[#allocation2 + $0x9a0] sm:$0xff]   ;;  %v7460_v38 = vld [vmem:[#allocation2 + $0x998] sm:$0xff]  }
 0x128   :  { %6796 = vmatpush3.bf16.msra.mxu0 %v7419_v31  ;;  %v7454_v31 = vld [vmem:[#allocation2 + $0x9e0] sm:$0xff]  }
 0x129   :  { %6797 = vmatprep.subr.bf16.mxu0 %v7421_v37  ;;  %6818 = vmatpush3.bf16.msra.mxu1 %v7420_v34  ;;  %v7457_v34 = vld [vmem:[#allocation2 + $0x958] sm:$0xff]  }
 0x12a   :  { %6819 = vmatprep.subr.bf16.mxu1 %v7422_v39  ;;  %v7459_v37 = vld [vmem:[#allocation2 + $0x918] sm:$0xff]   ;;  %v7461_v39 = vld [vmem:[#allocation2 + $0x950] sm:$0xff]  }
 0x12c   :  { %6798 = vmatpush3.bf16.msra.mxu0 %v7423_v40  ;;  %v7462_v40 = vld [vmem:[#allocation2 + $0x9d0] sm:$0xff]  }
 0x12d   :  { %6799 = vmatprep.subr.bf16.mxu0 %v7425_v42  ;;  %6820 = vmatpush3.bf16.msra.mxu1 %v7424_v41  ;;  %v7463_v41 = vld [vmem:[#allocation2 + $0x910] sm:$0xff]  }
 0x12e   :  { %6821 = vmatprep.subr.bf16.mxu1 %v7426_v43  ;;  %v7464_v42 = vld [vmem:[#allocation2 + $0x990] sm:$0xff]   ;;  %v7465_v43 = vld [vmem:[#allocation2 + $0x948] sm:$0xff]  }
 0x130   :  { %6800 = vmatpush3.bf16.msra.mxu0 %v7427_v44  ;;  %v7466_v44 = vld [vmem:[#allocation2 + $0x9c8] sm:$0xff]  }
 0x131   :  { %6801 = vmatprep.subr.bf16.mxu0 %v7429_v46  ;;  %6822 = vmatpush3.bf16.msra.mxu1 %v7428_v45  ;;  %v7467_v45 = vld [vmem:[#allocation2 + $0x908] sm:$0xff]  }
 0x132   :  { %6823 = vmatprep.subr.bf16.mxu1 %v7430_v47  ;;  %v7468_v46 = vld [vmem:[#allocation2 + $0x988] sm:$0xff]   ;;  %v7469_v47 = vld [vmem:[#allocation2 + $0x940] sm:$0xff]  }
 0x134   :  { %6802 = vmatpush3.bf16.msra.mxu0 %v7431_v48  ;;  %v7470_v48 = vld [vmem:[#allocation2 + $0x9c0] sm:$0xff]  }
 0x135   :  { %6803 = vmatprep.subr.bf16.mxu0 %v7433_v50  ;;  %6824 = vmatpush3.bf16.msra.mxu1 %v7432_v49  ;;  %v7471_v49 = vld [vmem:[#allocation2 + $0x900] sm:$0xff]  }
 0x136   :  { %6825 = vmatprep.subr.bf16.mxu1 %v7434_v51  ;;  %v7472_v50 = vld [vmem:[#allocation2 + $0x980] sm:$0xff]   ;;  %v1325_v51 = vrot.slane %v7836_v1, %v7767_v35  ;;  %v7482_v1 = vld [vmem:[#allocation2 + $0xa68] sm:$0xff]  }
 0x138   :  { %6804 = vmatpush3.bf16.msra.mxu0 %v7435_v52  ;;  %v7474_v52 = vld [vmem:[#allocation2 + $0xa78] sm:$0xff]  }
 0x139   :  { %6805 = vmatprep.subr.bf16.mxu0 %v7437_v54  ;;  %6826 = vmatpush3.bf16.msra.mxu1 %v7436_v53  ;;  %v7475_v53 = vld [vmem:[#allocation2 + $0xaf8] sm:$0xff]  }
 0x13a   :  { %6827 = vmatprep.subr.bf16.mxu1 %v7438_v55  ;;  %v7476_v54 = vld [vmem:[#allocation2 + $0xa38] sm:$0xff]  }
 0x13b   :  { %v7477_v55 = vld [vmem:[#allocation2 + $0xab8] sm:$0xff]  }
 0x13c   :  { %6806 = vmatpush3.bf16.msra.mxu0 %v7439_v56  ;;  %v1341_v56 = vcombine.high %v1325_v51, %v1325_v51 }
 0x13d   :  { %6835 = vmatprep.subr.bf16.mxu0 %v7441_v61  ;;  %6828 = vmatpush3.bf16.msra.mxu1 %v7440_v58 }
 0x13e   :  { %6857 = vmatprep.subr.bf16.mxu1 %v7442_v0 }
 0x13f   :  { %v6543_v9 = vpop.f32.mrf.mxu0  ;;  %5300 = vmatmul.mubr.bf16.vlgmr.msra.gmra.mxu0 %v1318_v63  ;;  %v7481_v63 = vld [vmem:[#allocation2 + $0xab0] sm:$0xff]  }
 0x140   :  { %v6565_v13 = vpop.f32.mrf.mxu1  ;;  %6836 = vmatpush3.bf16.msra.mxu0 %v7443_v2  ;;  %5340 = vmatmul.mubr.bf16.vlgmr.msra.gmra.mxu1 %v1340_v6 }
 0x141   :  { %v6544_v14 = vpop.f32.mrf.mxu0  ;;  %6837 = vmatprep.subr.bf16.mxu0 %v7445_v7  ;;  %6858 = vmatpush3.bf16.msra.mxu1 %v7444_v4  ;;  %v7483_v4 = vld [vmem:[#allocation2 + $0xae8] sm:$0xff]  }
 0x142   :  { %v6545_v17 = vadd.f32 %v6544_v14, %v6543_v9  ;;  %v6566_v19 = vpop.f32.mrf.mxu1  ;;  %5379 = vmatprep.mubr.bf16.mxu0 %v1339_v11  ;;  %6859 = vmatprep.subr.bf16.mxu1 %v7446_v10  ;;  %v7484_v7 = vld [vmem:[#allocation2 + $0xa28] sm:$0xff]   ;;  %v7487_v14 = vld [vmem:[#allocation2 + $0xae0] sm:$0xff]  }
 0x143   :  { %v6546_v20 = vpop.f32.mrf.mxu0  ;;  %v6567_v23 = vadd.f32 %v6566_v19, %v6565_v13  ;;  %5419 = vmatprep.mubr.bf16.mxu1 %v1343_v16  ;;  %v7485_v10 = vld [vmem:[#allocation2 + $0xaa8] sm:$0xff]   ;;  %v7489_v16 = vld [vmem:[#allocation2 + $0xaa0] sm:$0xff]   ;;  %v7492_v19 = vld [vmem:[#allocation2 + $0xa18] sm:$0xff]  }
 0x144   :  { %v4822_v22 = vadd.f32 %v6545_v17, %v7828_v36  ;;  %v6568_v25 = vpop.f32.mrf.mxu1  ;;  %6838 = vmatpush3.bf16.msra.mxu0 %v7447_v12  ;;  %v7458_v36 = vld [vmem:[#allocation2 + $0x9d8] sm:$0xff]   ;;  %v7486_v12 = vld [vmem:[#allocation2 + $0xa60] sm:$0xff]  }
 0x145   :  { %v6547_v26 = vpop.f32.mrf.mxu0  ;;  %6839 = vmatprep.subr.bf16.mxu0 %v7449_v18  ;;  %6860 = vmatpush3.bf16.msra.mxu1 %v7448_v15  ;;  %v7488_v15 = vld [vmem:[#allocation2 + $0xa20] sm:$0xff]   ;;  %v7490_v17 = vld [vmem:[#allocation2 + $0xa58] sm:$0xff]   ;;  %v7498_v25 = vld [vmem:[#allocation2 + $0xa48] sm:$0xff]  }
 0x146   :  { %v7843_v28 = vadd.f32 %v6567_v23, %v4822_v22  ;;  %v6569_v30 = vpop.f32.mrf.mxu1  ;;  %6861 = vmatprep.subr.bf16.mxu1 %v7450_v21  ;;  %v7491_v18 = vld [vmem:[#allocation2 + $0xad8] sm:$0xff]   ;;  %v7494_v21 = vld [vmem:[#allocation2 + $0xa50] sm:$0xff]   ;;  %v7499_v26 = vld [vmem:[#allocation2 + $0xac8] sm:$0xff]  }
 0x147   :  { %v7493_v20 = vld [vmem:[#allocation2 + $0xa98] sm:$0xff]   ;;  %v7495_v22 = vld [vmem:[#allocation2 + $0xad0] sm:$0xff]   ;;  %v7503_v30 = vld [vmem:[#allocation2 + $0xac0] sm:$0xff]  }
 0x148   :  { %6840 = vmatpush3.bf16.msra.mxu0 %v7451_v24  ;;  %v7496_v23 = vld [vmem:[#allocation2 + $0xa10] sm:$0xff]  }
 0x149   :  { %6841 = vmatprep.subr.bf16.mxu0 %v7453_v29  ;;  %6862 = vmatpush3.bf16.msra.mxu1 %v7452_v27  ;;  %v7497_v24 = vld [vmem:[#allocation2 + $0xa90] sm:$0xff]   ;;  %v7500_v27 = vld [vmem:[#allocation2 + $0xa08] sm:$0xff]   ;;  %v7502_v29 = vld [vmem:[#allocation2 + $0xa40] sm:$0xff]  }
 0x14a   :  { %6863 = vmatprep.subr.bf16.mxu1 %v7454_v31  ;;  %v7504_v31 = vld [vmem:[#allocation2 + $0xa00] sm:$0xff]  }
 0x14c   :  { %6842 = vmatpush3.bf16.msra.mxu0 %v7455_v32  ;;  %v63_v32 = vld [vmem:[%s7908_s0 + $0x28] sm:$0xff] }
 0x14d   :  { %6843 = vmatprep.subr.bf16.mxu0 %v7457_v34  ;;  %6864 = vmatpush3.bf16.msra.mxu1 %v7456_v33  ;;  %v7505_v33 = vld [vmem:[#allocation2 + $0xa80] sm:$0xff]   ;;  %v1351_v34 = vrot.slane %v63_v32, %v7767_v35 }
 0x14e   :  { %6865 = vmatprep.subr.bf16.mxu1 %v7458_v36  ;;  %v1344_v36 = vcombine.high %v63_v32, %v63_v32  ;;  %v7543_v32 = vld [vmem:[#allocation2 + $0xc70] sm:$0xff]  }
 0x150   :  { %6844 = vmatpush3.bf16.msra.mxu0 %v7459_v37  ;;  %v7506_v37 = vld [vmem:[#allocation2 + $0xb78] sm:$0xff]  }
 0x151   :  { %6845 = vmatprep.subr.bf16.mxu0 %v7461_v39  ;;  %6866 = vmatpush3.bf16.msra.mxu1 %v7460_v38  ;;  %v1359_v38 = vcombine.high %v1351_v34, %v1351_v34  ;;  %v1367_v39 = vrot.slane %v1351_v34, %v7767_v35  ;;  %v7544_v34 = vld [vmem:[#allocation2 + $0xcf0] sm:$0xff]  }
 0x152   :  { %6867 = vmatprep.subr.bf16.mxu1 %v7462_v40  ;;  %v7507_v40 = vld [vmem:[#allocation2 + $0xbf8] sm:$0xff]  }
 0x154   :  { %6846 = vmatpush3.bf16.msra.mxu0 %v7463_v41  ;;  %v7856_v41 = vrot.slane %v1344_v36, %v7767_v35  ;;  %v7545_v36 = vld [vmem:[#allocation2 + $0xc30] sm:$0xff]  }
 0x155   :  { %6847 = vmatprep.subr.bf16.mxu0 %v7465_v43  ;;  %6868 = vmatpush3.bf16.msra.mxu1 %v7464_v42  ;;  %v7508_v42 = vld [vmem:[#allocation2 + $0xb38] sm:$0xff]   ;;  %v1381_v43 = vrot.slane %v1359_v38, %v7767_v35 }
 0x156   :  { %6869 = vmatprep.subr.bf16.mxu1 %v7466_v44  ;;  %v7509_v44 = vld [vmem:[#allocation2 + $0xbb8] sm:$0xff]  }
 0x158   :  { %6848 = vmatpush3.bf16.msra.mxu0 %v7467_v45  ;;  %v1360_v45 = vcombine.high %v7856_v41, %v7856_v41 }
 0x159   :  { %6849 = vmatprep.subr.bf16.mxu0 %v7469_v47  ;;  %6870 = vmatpush3.bf16.msra.mxu1 %v7468_v46  ;;  %v1389_v46 = vcombine.high %v1367_v39, %v1367_v39  ;;  %v7510_v47 = vld [vmem:[#allocation2 + $0xb70] sm:$0xff]  }
 0x15a   :  { %6871 = vmatprep.subr.bf16.mxu1 %v7470_v48  ;;  %v1391_v48 = vcombine.high %v1381_v43, %v1381_v43 }
 0x15c   :  { %6850 = vmatpush3.bf16.msra.mxu0 %v7471_v49 }
 0x15d   :  { %6879 = vmatprep.subr.bf16.mxu0 %v7474_v52  ;;  %6872 = vmatpush3.bf16.msra.mxu1 %v7472_v50  ;;  %v7511_v50 = vld [vmem:[#allocation2 + $0xbf0] sm:$0xff]  }
 0x15e   :  { %6901 = vmatprep.subr.bf16.mxu1 %v7475_v53  ;;  %v7512_v52 = vld [vmem:[#allocation2 + $0xb30] sm:$0xff]  }
 0x15f   :  { %v6587_v58 = vpop.f32.mrf.mxu0  ;;  %5380 = vmatmul.mubr.bf16.vlgmr.msra.gmra.mxu0 %v1325_v51  ;;  %v1388_v51 = vrot.slane %v1360_v45, %v7767_v35 }
 0x160   :  { %v6609_v61 = vpop.f32.mrf.mxu1  ;;  %6880 = vmatpush3.bf16.msra.mxu0 %v7476_v54  ;;  %5420 = vmatmul.mubr.bf16.vlgmr.msra.gmra.mxu1 %v1341_v56 }
 0x161   :  { %v6588_v62 = vpop.f32.mrf.mxu0  ;;  %6881 = vmatprep.subr.bf16.mxu0 %v7478_v57  ;;  %6902 = vmatpush3.bf16.msra.mxu1 %v7477_v55  ;;  %v7513_v55 = vld [vmem:[#allocation2 + $0xbb0] sm:$0xff]   ;;  %v1392_v56 = vcombine.high %v1388_v51, %v1388_v51 }
 0x162   :  { %v6589_v0 = vadd.f32 %v6588_v62, %v6587_v58  ;;  %v6610_v2 = vpop.f32.mrf.mxu1  ;;  %6903 = vmatprep.subr.bf16.mxu1 %v7479_v59  ;;  %5459 = vmatprep.mubr.bf16.mxu0 %v1381_v43  ;;  %v7514_v58 = vld [vmem:[#allocation2 + $0xb68] sm:$0xff]  }
 0x163   :  { %v6590_v3 = vpop.f32.mrf.mxu0  ;;  %v6611_v6 = vadd.f32 %v6610_v2, %v6609_v61  ;;  %5499 = vmatprep.mubr.bf16.mxu1 %v1391_v48  ;;  %v7515_v61 = vld [vmem:[#allocation2 + $0xbe8] sm:$0xff]  }
 0x164   :  { %v4902_v5 = vadd.f32 %v6589_v0, %v7843_v28  ;;  %v6612_v8 = vpop.f32.mrf.mxu1  ;;  %6882 = vmatpush3.bf16.msra.mxu0 %v7480_v60  ;;  %v7501_v28 = vld [vmem:[#allocation2 + $0xa88] sm:$0xff]  }
 0x165   :  { %v6591_v9 = vpop.f32.mrf.mxu0  ;;  %6883 = vmatprep.subr.bf16.mxu0 %v7482_v1  ;;  %6904 = vmatpush3.bf16.msra.mxu1 %v7481_v63  ;;  %v7516_v0 = vld [vmem:[#allocation2 + $0xb28] sm:$0xff]   ;;  %v7520_v8 = vld [vmem:[#allocation2 + $0xb20] sm:$0xff]  }
 0x166   :  { %v7848_v11 = vadd.f32 %v6611_v6, %v4902_v5  ;;  %v6613_v13 = vpop.f32.mrf.mxu1  ;;  %6905 = vmatprep.subr.bf16.mxu1 %v7483_v4  ;;  %v7517_v3 = vld [vmem:[#allocation2 + $0xba8] sm:$0xff]   ;;  %v7518_v5 = vld [vmem:[#allocation2 + $0xb60] sm:$0xff]  }
 0x167   :  { %v7521_v9 = vld [vmem:[#allocation2 + $0xba0] sm:$0xff]   ;;  %v7525_v13 = vld [vmem:[#allocation2 + $0xb98] sm:$0xff]  }
 0x168   :  { %6884 = vmatpush3.bf16.msra.mxu0 %v7484_v7  ;;  %v7519_v7 = vld [vmem:[#allocation2 + $0xbe0] sm:$0xff]  }
 0x169   :  { %6885 = vmatprep.subr.bf16.mxu0 %v7486_v12  ;;  %6906 = vmatpush3.bf16.msra.mxu1 %v7485_v10  ;;  %v7522_v10 = vld [vmem:[#allocation2 + $0xb58] sm:$0xff]  }
 0x16a   :  { %6907 = vmatprep.subr.bf16.mxu1 %v7487_v14  ;;  %v7524_v12 = vld [vmem:[#allocation2 + $0xb18] sm:$0xff]   ;;  %v7526_v14 = vld [vmem:[#allocation2 + $0xb50] sm:$0xff]  }
 0x16c   :  { %6886 = vmatpush3.bf16.msra.mxu0 %v7488_v15  ;;  %v7527_v15 = vld [vmem:[#allocation2 + $0xbd0] sm:$0xff]  }
 0x16d   :  { %6887 = vmatprep.subr.bf16.mxu0 %v7490_v17  ;;  %6908 = vmatpush3.bf16.msra.mxu1 %v7489_v16  ;;  %v7528_v16 = vld [vmem:[#allocation2 + $0xb10] sm:$0xff]  }
 0x16e   :  { %6909 = vmatprep.subr.bf16.mxu1 %v7491_v18  ;;  %v7529_v17 = vld [vmem:[#allocation2 + $0xb90] sm:$0xff]   ;;  %v7530_v18 = vld [vmem:[#allocation2 + $0xb48] sm:$0xff]  }
 0x170   :  { %6888 = vmatpush3.bf16.msra.mxu0 %v7492_v19  ;;  %v7531_v19 = vld [vmem:[#allocation2 + $0xbc8] sm:$0xff]  }
 0x171   :  { %6889 = vmatprep.subr.bf16.mxu0 %v7494_v21  ;;  %6910 = vmatpush3.bf16.msra.mxu1 %v7493_v20  ;;  %v7532_v20 = vld [vmem:[#allocation2 + $0xb08] sm:$0xff]  }
 0x172   :  { %6911 = vmatprep.subr.bf16.mxu1 %v7495_v22  ;;  %v7533_v21 = vld [vmem:[#allocation2 + $0xb88] sm:$0xff]   ;;  %v7534_v22 = vld [vmem:[#allocation2 + $0xb40] sm:$0xff]  }
 0x174   :  { %6890 = vmatpush3.bf16.msra.mxu0 %v7496_v23  ;;  %v7535_v23 = vld [vmem:[#allocation2 + $0xbc0] sm:$0xff]  }
 0x175   :  { %6891 = vmatprep.subr.bf16.mxu0 %v7498_v25  ;;  %6912 = vmatpush3.bf16.msra.mxu1 %v7497_v24  ;;  %v7536_v24 = vld [vmem:[#allocation2 + $0xb00] sm:$0xff]  }
 0x176   :  { %6913 = vmatprep.subr.bf16.mxu1 %v7499_v26  ;;  %v7537_v25 = vld [vmem:[#allocation2 + $0xb80] sm:$0xff]   ;;  %v1374_v26 = vrot.slane %v7856_v41, %v7767_v35  ;;  %v7547_v41 = vld [vmem:[#allocation2 + $0xc68] sm:$0xff]  }
 0x178   :  { %6892 = vmatpush3.bf16.msra.mxu0 %v7500_v27  ;;  %v7539_v27 = vld [vmem:[#allocation2 + $0xc78] sm:$0xff]  }
 0x179   :  { %6893 = vmatprep.subr.bf16.mxu0 %v7502_v29  ;;  %6914 = vmatpush3.bf16.msra.mxu1 %v7501_v28  ;;  %v7540_v28 = vld [vmem:[#allocation2 + $0xcf8] sm:$0xff]  }
 0x17a   :  { %6915 = vmatprep.subr.bf16.mxu1 %v7503_v30  ;;  %v7541_v29 = vld [vmem:[#allocation2 + $0xc38] sm:$0xff]  }
 0x17b   :  { %v7542_v30 = vld [vmem:[#allocation2 + $0xcb8] sm:$0xff]  }
 0x17c   :  { %6894 = vmatpush3.bf16.msra.mxu0 %v7504_v31  ;;  %v1390_v31 = vcombine.high %v1374_v26, %v1374_v26 }
 0x17d   :  { %6923 = vmatprep.subr.bf16.mxu0 %v7506_v37  ;;  %6916 = vmatpush3.bf16.msra.mxu1 %v7505_v33 }
 0x17e   :  { %6945 = vmatprep.subr.bf16.mxu1 %v7507_v40 }
 0x17f   :  { %v6631_v49 = vpop.f32.mrf.mxu0  ;;  %5460 = vmatmul.mubr.bf16.vlgmr.msra.gmra.mxu0 %v1367_v39  ;;  %v7546_v39 = vld [vmem:[#allocation2 + $0xcb0] sm:$0xff]  }
 0x180   :  { %v6653_v53 = vpop.f32.mrf.mxu1  ;;  %6924 = vmatpush3.bf16.msra.mxu0 %v7508_v42  ;;  %5500 = vmatmul.mubr.bf16.vlgmr.msra.gmra.mxu1 %v1389_v46 }
 0x181   :  { %v6632_v54 = vpop.f32.mrf.mxu0  ;;  %6925 = vmatprep.subr.bf16.mxu0 %v7510_v47  ;;  %6946 = vmatpush3.bf16.msra.mxu1 %v7509_v44  ;;  %v7548_v44 = vld [vmem:[#allocation2 + $0xce8] sm:$0xff]  }
 0x182   :  { %v6633_v57 = vadd.f32 %v6632_v54, %v6631_v49  ;;  %v6654_v59 = vpop.f32.mrf.mxu1  ;;  %5539 = vmatprep.mubr.bf16.mxu0 %v1388_v51  ;;  %6947 = vmatprep.subr.bf16.mxu1 %v7511_v50  ;;  %v7549_v47 = vld [vmem:[#allocation2 + $0xc28] sm:$0xff]   ;;  %v7552_v54 = vld [vmem:[#allocation2 + $0xce0] sm:$0xff]  }
 0x183   :  { %v6634_v60 = vpop.f32.mrf.mxu0  ;;  %v6655_v63 = vadd.f32 %v6654_v59, %v6653_v53  ;;  %5579 = vmatprep.mubr.bf16.mxu1 %v1392_v56  ;;  %v7550_v50 = vld [vmem:[#allocation2 + $0xca8] sm:$0xff]   ;;  %v7554_v56 = vld [vmem:[#allocation2 + $0xca0] sm:$0xff]   ;;  %v7557_v59 = vld [vmem:[#allocation2 + $0xc18] sm:$0xff]  }
 0x184   :  { %v4982_v62 = vadd.f32 %v6633_v57, %v7848_v11  ;;  %v6656_v1 = vpop.f32.mrf.mxu1  ;;  %6926 = vmatpush3.bf16.msra.mxu0 %v7512_v52  ;;  %v7523_v11 = vld [vmem:[#allocation2 + $0xbd8] sm:$0xff]   ;;  %v7551_v52 = vld [vmem:[#allocation2 + $0xc60] sm:$0xff]  }
 0x185   :  { %v6635_v2 = vpop.f32.mrf.mxu0  ;;  %6927 = vmatprep.subr.bf16.mxu0 %v7514_v58  ;;  %6948 = vmatpush3.bf16.msra.mxu1 %v7513_v55  ;;  %v7553_v55 = vld [vmem:[#allocation2 + $0xc20] sm:$0xff]   ;;  %v7555_v57 = vld [vmem:[#allocation2 + $0xc58] sm:$0xff]   ;;  %v7563_v1 = vld [vmem:[#allocation2 + $0xc48] sm:$0xff]  }
 0x186   :  { %v7863_v4 = vadd.f32 %v6655_v63, %v4982_v62  ;;  %v6657_v6 = vpop.f32.mrf.mxu1  ;;  %6949 = vmatprep.subr.bf16.mxu1 %v7515_v61  ;;  %v7556_v58 = vld [vmem:[#allocation2 + $0xcd8] sm:$0xff]   ;;  %v7559_v61 = vld [vmem:[#allocation2 + $0xc50] sm:$0xff]   ;;  %v7564_v2 = vld [vmem:[#allocation2 + $0xcc8] sm:$0xff]  }
 0x187   :  { %v7558_v60 = vld [vmem:[#allocation2 + $0xc98] sm:$0xff]   ;;  %v7560_v62 = vld [vmem:[#allocation2 + $0xcd0] sm:$0xff]   ;;  %v7568_v6 = vld [vmem:[#allocation2 + $0xcc0] sm:$0xff]  }
 0x188   :  { %6928 = vmatpush3.bf16.msra.mxu0 %v7516_v0  ;;  %v7561_v63 = vld [vmem:[#allocation2 + $0xc10] sm:$0xff]  }
 0x189   :  { %6929 = vmatprep.subr.bf16.mxu0 %v7518_v5  ;;  %6950 = vmatpush3.bf16.msra.mxu1 %v7517_v3  ;;  %v7562_v0 = vld [vmem:[#allocation2 + $0xc90] sm:$0xff]   ;;  %v7565_v3 = vld [vmem:[#allocation2 + $0xc08] sm:$0xff]   ;;  %v7567_v5 = vld [vmem:[#allocation2 + $0xc40] sm:$0xff]  }
 0x18a   :  { %6951 = vmatprep.subr.bf16.mxu1 %v7519_v7  ;;  %v7569_v7 = vld [vmem:[#allocation2 + $0xc00] sm:$0xff]  }
 0x18c   :  { %6930 = vmatpush3.bf16.msra.mxu0 %v7520_v8  ;;  %v64_v8 = vld [vmem:[%s7908_s0 + $0x30] sm:$0xff] }
 0x18d   :  { %6931 = vmatprep.subr.bf16.mxu0 %v7522_v10  ;;  %6952 = vmatpush3.bf16.msra.mxu1 %v7521_v9  ;;  %v1400_v9 = vrot.slane %v64_v8, %v7767_v35  ;;  %v7571_v10 = vld [vmem:[#allocation2 + $0xd78] sm:$0xff]  }
 0x18e   :  { %6953 = vmatprep.subr.bf16.mxu1 %v7523_v11  ;;  %v1393_v11 = vcombine.high %v64_v8, %v64_v8 }
 0x190   :  { %6932 = vmatpush3.bf16.msra.mxu0 %v7524_v12  ;;  %v7570_v12 = vld [vmem:[#allocation2 + $0xc80] sm:$0xff]  }
 0x191   :  { %6933 = vmatprep.subr.bf16.mxu0 %v7526_v14  ;;  %6954 = vmatpush3.bf16.msra.mxu1 %v7525_v13  ;;  %v1408_v13 = vcombine.high %v1400_v9, %v1400_v9  ;;  %v1416_v14 = vrot.slane %v1400_v9, %v7767_v35  ;;  %v7607_v9 = vld [vmem:[#allocation2 + $0xeb8] sm:$0xff]  }
 0x192   :  { %6955 = vmatprep.subr.bf16.mxu1 %v7527_v15  ;;  %v7572_v15 = vld [vmem:[#allocation2 + $0xdf8] sm:$0xff]  }
 0x194   :  { %6934 = vmatpush3.bf16.msra.mxu0 %v7528_v16  ;;  %v7876_v16 = vrot.slane %v1393_v11, %v7767_v35 }
 0x195   :  { %6935 = vmatprep.subr.bf16.mxu0 %v7530_v18  ;;  %6956 = vmatpush3.bf16.msra.mxu1 %v7529_v17  ;;  %v1430_v17 = vrot.slane %v1408_v13, %v7767_v35  ;;  %v7573_v18 = vld [vmem:[#allocation2 + $0xd38] sm:$0xff]   ;;  %v7610_v13 = vld [vmem:[#allocation2 + $0xe30] sm:$0xff]  }
 0x196   :  { %6957 = vmatprep.subr.bf16.mxu1 %v7531_v19  ;;  %v1409_v19 = vcombine.high %v7876_v16, %v7876_v16 }
 0x198   :  { %6936 = vmatpush3.bf16.msra.mxu0 %v7532_v20  ;;  %v1438_v20 = vcombine.high %v1416_v14, %v1416_v14 }
 0x199   :  { %6937 = vmatprep.subr.bf16.mxu0 %v7534_v22  ;;  %6958 = vmatpush3.bf16.msra.mxu1 %v7533_v21  ;;  %v7575_v21 = vld [vmem:[#allocation2 + $0xd70] sm:$0xff]   ;;  %v1440_v22 = vcombine.high %v1430_v17, %v1430_v17 }
 0x19a   :  { %6959 = vmatprep.subr.bf16.mxu1 %v7535_v23 }
 0x19c   :  { %6938 = vmatpush3.bf16.msra.mxu0 %v7536_v24  ;;  %v7574_v24 = vld [vmem:[#allocation2 + $0xdb8] sm:$0xff]  }
 0x19d   :  { %6967 = vmatprep.subr.bf16.mxu0 %v7539_v27  ;;  %6960 = vmatpush3.bf16.msra.mxu1 %v7537_v25  ;;  %v1437_v25 = vrot.slane %v1409_v19, %v7767_v35 }
 0x19e   :  { %6989 = vmatprep.subr.bf16.mxu1 %v7540_v28 }
 0x19f   :  { %v6675_v33 = vpop.f32.mrf.mxu0  ;;  %5540 = vmatmul.mubr.bf16.vlgmr.msra.gmra.mxu0 %v1374_v26  ;;  %v7576_v26 = vld [vmem:[#allocation2 + $0xdf0] sm:$0xff]  }
 0x1a0   :  { %v6697_v37 = vpop.f32.mrf.mxu1  ;;  %6968 = vmatpush3.bf16.msra.mxu0 %v7541_v29  ;;  %5580 = vmatmul.mubr.bf16.vlgmr.msra.gmra.mxu1 %v1390_v31  ;;  %v7577_v29 = vld [vmem:[#allocation2 + $0xd30] sm:$0xff]  }
 0x1a1   :  { %v6676_v38 = vpop.f32.mrf.mxu0  ;;  %6969 = vmatprep.subr.bf16.mxu0 %v7543_v32  ;;  %6990 = vmatpush3.bf16.msra.mxu1 %v7542_v30  ;;  %v1441_v30 = vcombine.high %v1437_v25, %v1437_v25  ;;  %v7579_v32 = vld [vmem:[#allocation2 + $0xd68] sm:$0xff]  }
 0x1a2   :  { %v6677_v40 = vadd.f32 %v6676_v38, %v6675_v33  ;;  %v6698_v42 = vpop.f32.mrf.mxu1  ;;  %6991 = vmatprep.subr.bf16.mxu1 %v7544_v34  ;;  %5619 = vmatprep.mubr.bf16.mxu0 %v1430_v17 }
 0x1a3   :  { %v6678_v43 = vpop.f32.mrf.mxu0  ;;  %v6699_v46 = vadd.f32 %v6698_v42, %v6697_v37  ;;  %5659 = vmatprep.mubr.bf16.mxu1 %v1440_v22  ;;  %v7581_v42 = vld [vmem:[#allocation2 + $0xd28] sm:$0xff]  }
 0x1a4   :  { %v5062_v45 = vadd.f32 %v6677_v40, %v7863_v4  ;;  %v6700_v48 = vpop.f32.mrf.mxu1  ;;  %6970 = vmatpush3.bf16.msra.mxu0 %v7545_v36  ;;  %v7566_v4 = vld [vmem:[#allocation2 + $0xc88] sm:$0xff]   ;;  %v7578_v36 = vld [vmem:[#allocation2 + $0xdb0] sm:$0xff]  }
 0x1a5   :  { %v6679_v49 = vpop.f32.mrf.mxu0  ;;  %6971 = vmatprep.subr.bf16.mxu0 %v7547_v41  ;;  %6992 = vmatpush3.bf16.msra.mxu1 %v7546_v39  ;;  %v7580_v39 = vld [vmem:[#allocation2 + $0xde8] sm:$0xff]   ;;  %v7585_v48 = vld [vmem:[#allocation2 + $0xd20] sm:$0xff]  }
 0x1a6   :  { %v7868_v51 = vadd.f32 %v6699_v46, %v5062_v45  ;;  %v6701_v53 = vpop.f32.mrf.mxu1  ;;  %6993 = vmatprep.subr.bf16.mxu1 %v7548_v44  ;;  %v7583_v44 = vld [vmem:[#allocation2 + $0xd60] sm:$0xff]   ;;  %v7582_v46 = vld [vmem:[#allocation2 + $0xda8] sm:$0xff]   ;;  %v7587_v49 = vld [vmem:[#allocation2 + $0xd58] sm:$0xff]  }
 0x1a7   :  { %v7591_v53 = vld [vmem:[#allocation2 + $0xd50] sm:$0xff]  }
 0x1a8   :  { %6972 = vmatpush3.bf16.msra.mxu0 %v7549_v47  ;;  %v7584_v47 = vld [vmem:[#allocation2 + $0xde0] sm:$0xff]  }
 0x1a9   :  { %6973 = vmatprep.subr.bf16.mxu0 %v7551_v52  ;;  %6994 = vmatpush3.bf16.msra.mxu1 %v7550_v50  ;;  %v7586_v50 = vld [vmem:[#allocation2 + $0xda0] sm:$0xff]   ;;  %v7589_v52 = vld [vmem:[#allocation2 + $0xd18] sm:$0xff]  }
 0x1aa   :  { %6995 = vmatprep.subr.bf16.mxu1 %v7552_v54  ;;  %v7590_v54 = vld [vmem:[#allocation2 + $0xd98] sm:$0xff]  }
 0x1ac   :  { %6974 = vmatpush3.bf16.msra.mxu0 %v7553_v55  ;;  %v7592_v55 = vld [vmem:[#allocation2 + $0xdd0] sm:$0xff]  }
 0x1ad   :  { %6975 = vmatprep.subr.bf16.mxu0 %v7555_v57  ;;  %6996 = vmatpush3.bf16.msra.mxu1 %v7554_v56  ;;  %v7593_v56 = vld [vmem:[#allocation2 + $0xd10] sm:$0xff]   ;;  %v7595_v57 = vld [vmem:[#allocation2 + $0xd48] sm:$0xff]  }
 0x1ae   :  { %6997 = vmatprep.subr.bf16.mxu1 %v7556_v58  ;;  %v7594_v58 = vld [vmem:[#allocation2 + $0xd90] sm:$0xff]  }
 0x1b0   :  { %6976 = vmatpush3.bf16.msra.mxu0 %v7557_v59  ;;  %v7596_v59 = vld [vmem:[#allocation2 + $0xdc8] sm:$0xff]  }
 0x1b1   :  { %6977 = vmatprep.subr.bf16.mxu0 %v7559_v61  ;;  %6998 = vmatpush3.bf16.msra.mxu1 %v7558_v60  ;;  %v7597_v60 = vld [vmem:[#allocation2 + $0xd08] sm:$0xff]   ;;  %v7599_v61 = vld [vmem:[#allocation2 + $0xd40] sm:$0xff]  }
 0x1b2   :  { %6999 = vmatprep.subr.bf16.mxu1 %v7560_v62  ;;  %v7598_v62 = vld [vmem:[#allocation2 + $0xd88] sm:$0xff]  }
 0x1b4   :  { %6978 = vmatpush3.bf16.msra.mxu0 %v7561_v63  ;;  %v7600_v63 = vld [vmem:[#allocation2 + $0xdc0] sm:$0xff]  }
 0x1b5   :  { %6979 = vmatprep.subr.bf16.mxu0 %v7563_v1  ;;  %7000 = vmatpush3.bf16.msra.mxu1 %v7562_v0  ;;  %v7601_v0 = vld [vmem:[#allocation2 + $0xd00] sm:$0xff]   ;;  %v1423_v1 = vrot.slane %v7876_v16, %v7767_v35 }
 0x1b6   :  { %7001 = vmatprep.subr.bf16.mxu1 %v7564_v2  ;;  %v7604_v2 = vld [vmem:[#allocation2 + $0xe78] sm:$0xff]  }
 0x1b8   :  { %6980 = vmatpush3.bf16.msra.mxu0 %v7565_v3  ;;  %v7602_v3 = vld [vmem:[#allocation2 + $0xd80] sm:$0xff]  }
 0x1b9   :  { %6981 = vmatprep.subr.bf16.mxu0 %v7567_v5  ;;  %7002 = vmatpush3.bf16.msra.mxu1 %v7566_v4  ;;  %v7605_v4 = vld [vmem:[#allocation2 + $0xef8] sm:$0xff]  }
 0x1ba   :  { %7003 = vmatprep.subr.bf16.mxu1 %v7568_v6  ;;  %v7606_v5 = vld [vmem:[#allocation2 + $0xe38] sm:$0xff]   ;;  %v1439_v6 = vcombine.high %v1423_v1, %v1423_v1 }
 0x1bc   :  { %6982 = vmatpush3.bf16.msra.mxu0 %v7569_v7  ;;  %v7608_v7 = vld [vmem:[#allocation2 + $0xe70] sm:$0xff]  }
 0x1bd   :  { %7011 = vmatprep.subr.bf16.mxu0 %v7571_v10  ;;  %7004 = vmatpush3.bf16.msra.mxu1 %v7570_v12  ;;  %v7609_v10 = vld [vmem:[#allocation2 + $0xef0] sm:$0xff]  }
 0x1be   :  { %7033 = vmatprep.subr.bf16.mxu1 %v7572_v15  ;;  %v7612_v15 = vld [vmem:[#allocation2 + $0xe68] sm:$0xff]  }
 0x1bf   :  { %v6719_v23 = vpop.f32.mrf.mxu0  ;;  %5620 = vmatmul.mubr.bf16.vlgmr.msra.gmra.mxu0 %v1416_v14 }
 0x1c0   :  { %v6741_v27 = vpop.f32.mrf.mxu1  ;;  %7012 = vmatpush3.bf16.msra.mxu0 %v7573_v18  ;;  %5660 = vmatmul.mubr.bf16.vlgmr.msra.gmra.mxu1 %v1438_v20  ;;  %v7611_v18 = vld [vmem:[#allocation2 + $0xeb0] sm:$0xff]  }
 0x1c1   :  { %v6720_v28 = vpop.f32.mrf.mxu0  ;;  %7013 = vmatprep.subr.bf16.mxu0 %v7575_v21  ;;  %7034 = vmatpush3.bf16.msra.mxu1 %v7574_v24  ;;  %v7613_v21 = vld [vmem:[#allocation2 + $0xee8] sm:$0xff]  }
 0x1c2   :  { %v6721_v31 = vadd.f32 %v6720_v28, %v6719_v23  ;;  %v6742_v33 = vpop.f32.mrf.mxu1  ;;  %5699 = vmatprep.mubr.bf16.mxu0 %v1437_v25  ;;  %7035 = vmatprep.subr.bf16.mxu1 %v7576_v26  ;;  %v7614_v24 = vld [vmem:[#allocation2 + $0xe28] sm:$0xff]   ;;  %v7616_v26 = vld [vmem:[#allocation2 + $0xe60] sm:$0xff]  }
 0x1c3   :  { %v6722_v34 = vpop.f32.mrf.mxu0  ;;  %v6743_v38 = vadd.f32 %v6742_v33, %v6741_v27  ;;  %5739 = vmatprep.mubr.bf16.mxu1 %v1441_v30  ;;  %v7615_v28 = vld [vmem:[#allocation2 + $0xea8] sm:$0xff]   ;;  %v7618_v30 = vld [vmem:[#allocation2 + $0xe20] sm:$0xff]   ;;  %v7621_v33 = vld [vmem:[#allocation2 + $0xed8] sm:$0xff]  }
 0x1c4   :  { %v5142_v37 = vadd.f32 %v6721_v31, %v7868_v51  ;;  %v6744_v40 = vpop.f32.mrf.mxu1  ;;  %7014 = vmatpush3.bf16.msra.mxu0 %v7577_v29  ;;  %v7588_v51 = vld [vmem:[#allocation2 + $0xdd8] sm:$0xff]   ;;  %v7617_v29 = vld [vmem:[#allocation2 + $0xee0] sm:$0xff]  }
 0x1c5   :  { %v6723_v41 = vpop.f32.mrf.mxu0  ;;  %7015 = vmatprep.subr.bf16.mxu0 %v7579_v32  ;;  %7036 = vmatpush3.bf16.msra.mxu1 %v7578_v36  ;;  %v7620_v31 = vld [vmem:[#allocation2 + $0xe58] sm:$0xff]   ;;  %v7619_v32 = vld [vmem:[#allocation2 + $0xea0] sm:$0xff]   ;;  %v7624_v36 = vld [vmem:[#allocation2 + $0xe50] sm:$0xff]  }
 0x1c6   :  { %v7883_v43 = vadd.f32 %v6743_v38, %v5142_v37  ;;  %v6745_v45 = vpop.f32.mrf.mxu1  ;;  %7037 = vmatprep.subr.bf16.mxu1 %v7580_v39  ;;  %v7622_v34 = vld [vmem:[#allocation2 + $0xe18] sm:$0xff]   ;;  %v7625_v38 = vld [vmem:[#allocation2 + $0xed0] sm:$0xff]   ;;  %v7628_v40 = vld [vmem:[#allocation2 + $0xe48] sm:$0xff]  }
 0x1c7   :  { %v7623_v37 = vld [vmem:[#allocation2 + $0xe98] sm:$0xff]   ;;  %v7626_v39 = vld [vmem:[#allocation2 + $0xe10] sm:$0xff]   ;;  %v7631_v45 = vld [vmem:[#allocation2 + $0xe88] sm:$0xff]  }
 0x1c8   :  { %7016 = vmatpush3.bf16.msra.mxu0 %v7581_v42  ;;  %v7627_v41 = vld [vmem:[#allocation2 + $0xe90] sm:$0xff]   ;;  %v7629_v42 = vld [vmem:[#allocation2 + $0xec8] sm:$0xff]  }
 0x1c9   :  { %7017 = vmatprep.subr.bf16.mxu0 %v7583_v44  ;;  %7038 = vmatpush3.bf16.msra.mxu1 %v7582_v46  ;;  %v7632_v44 = vld [vmem:[#allocation2 + $0xe40] sm:$0xff]  }
 0x1ca   :  { %7039 = vmatprep.subr.bf16.mxu1 %v7584_v47  ;;  %v7633_v46 = vld [vmem:[#allocation2 + $0xec0] sm:$0xff]   ;;  %v65_v47 = vld [vmem:[%s7908_s0 + $0x38] sm:$0xff]  ;;  %s7740_s0 = smov [#allocation7]  }
 0x1cb   :  { %s5915_s12 = sshll.u32 %s7740_s0, 4  ;;  %s5916_s12 = int_to_ptr.vmem [resolvable:$true] %s5915_s12 }
 0x1cc   :  { %7018 = vmatpush3.bf16.msra.mxu0 %v7585_v48  ;;  %v7634_v48 = vld [vmem:[#allocation2 + $0xe00] sm:$0xff]   ;;  %s7709_s13 = scalar_lea.vmem %s5916_s12, 32  ;;  %p7714_p11 = scmp.lt.s32.totalorder %s5916_s12, %s5916_s12 }
 0x1cd   :  { %7019 = vmatprep.subr.bf16.mxu0 %v7587_v49  ;;  %7040 = vmatpush3.bf16.msra.mxu1 %v7586_v50  ;;  %v1449_v49 = vrot.slane %v65_v47, %v7767_v35  ;;  %v1442_v50 = vcombine.high %v65_v47, %v65_v47  ;;  %p7710_p10 = scmp.ne.s32.totalorder %s5916_s12, %s7709_s13  ;;  %p7715_p12 = scmp.lt.s32.totalorder %s7709_s13, %s7709_s13 }
 0x1ce   :  { %7041 = vmatprep.subr.bf16.mxu1 %v7588_v51  ;;  %v7636_v51 = vld [vmem:[#allocation2 + $0xf78] sm:$0xff]  }
 0x1cf   :  { %p7716_p13 = por %p7715_p12, %p7714_p11 }
 0x1d0   :  { %7020 = vmatpush3.bf16.msra.mxu0 %v7589_v52  ;;  %v7635_v52 = vld [vmem:[#allocation2 + $0xe80] sm:$0xff]  }
 0x1d1   :  { %7021 = vmatprep.subr.bf16.mxu0 %v7591_v53  ;;  %7042 = vmatpush3.bf16.msra.mxu1 %v7590_v54  ;;  %v1457_v53 = vcombine.high %v1449_v49, %v1449_v49  ;;  %v1465_v54 = vrot.slane %v1449_v49, %v7767_v35  ;;  %p7717_p0 = pnand %p7716_p13, %p7710_p10 }
 0x1d2   :  { %7043 = vmatprep.subr.bf16.mxu1 %v7592_v55  ;;  %v7896_v55 = vrot.slane %v1442_v50, %v7767_v35 }
 0x1d4   :  { %7022 = vmatpush3.bf16.msra.mxu0 %v7593_v56  ;;  %v7637_v56 = vld [vmem:[#allocation2 + $0xff8] sm:$0xff]  }
 0x1d5   :  { %7023 = vmatprep.subr.bf16.mxu0 %v7595_v57  ;;  %7044 = vmatpush3.bf16.msra.mxu1 %v7594_v58  ;;  %v1479_v57 = vrot.slane %v1457_v53, %v7767_v35  ;;  %v7638_v58 = vld [vmem:[#allocation2 + $0xf38] sm:$0xff]  }
 0x1d6   :  { %7045 = vmatprep.subr.bf16.mxu1 %v7596_v59  ;;  %v1458_v59 = vcombine.high %v7896_v55, %v7896_v55 }
 0x1d8   :  { %7024 = vmatpush3.bf16.msra.mxu0 %v7597_v60  ;;  %v1487_v60 = vcombine.high %v1465_v54, %v1465_v54 }
 0x1d9   :  { %7025 = vmatprep.subr.bf16.mxu0 %v7599_v61  ;;  %7046 = vmatpush3.bf16.msra.mxu1 %v7598_v62  ;;  %v7640_v61 = vld [vmem:[#allocation2 + $0xf70] sm:$0xff]   ;;  %v1489_v62 = vcombine.high %v1479_v57, %v1479_v57 }
 0x1da   :  { %7047 = vmatprep.subr.bf16.mxu1 %v7600_v63 }
 0x1dc   :  { %7026 = vmatpush3.bf16.msra.mxu0 %v7601_v0  ;;  %v7639_v0 = vld [vmem:[#allocation2 + $0xfb8] sm:$0xff]  }
 0x1dd   :  { %7055 = vmatprep.subr.bf16.mxu0 %v7604_v2  ;;  %7048 = vmatpush3.bf16.msra.mxu1 %v7602_v3  ;;  %v7641_v2 = vld [vmem:[#allocation2 + $0xff0] sm:$0xff]  }
 0x1de   :  { %7077 = vmatprep.subr.bf16.mxu1 %v7605_v4 }
 0x1df   :  { %v6763_v8 = vpop.f32.mrf.mxu0  ;;  %5700 = vmatmul.mubr.bf16.vlgmr.msra.gmra.mxu0 %v1423_v1  ;;  %v1486_v1 = vrot.slane %v1458_v59, %v7767_v35 }
 0x1e0   :  { %v6785_v11 = vpop.f32.mrf.mxu1  ;;  %7056 = vmatpush3.bf16.msra.mxu0 %v7606_v5  ;;  %5740 = vmatmul.mubr.bf16.vlgmr.msra.gmra.mxu1 %v1439_v6  ;;  %v7642_v5 = vld [vmem:[#allocation2 + $0xf30] sm:$0xff]  }
 0x1e1   :  { %v6764_v12 = vpop.f32.mrf.mxu0  ;;  %7057 = vmatprep.subr.bf16.mxu0 %v7608_v7  ;;  %7078 = vmatpush3.bf16.msra.mxu1 %v7607_v9  ;;  %v1490_v6 = vcombine.high %v1486_v1, %v1486_v1 }
 0x1e2   :  { %v6765_v14 = vadd.f32 %v6764_v12, %v6763_v8  ;;  %v6786_v16 = vpop.f32.mrf.mxu1  ;;  %7079 = vmatprep.subr.bf16.mxu1 %v7609_v10  ;;  %5779 = vmatprep.mubr.bf16.mxu0 %v1479_v57  ;;  %v7644_v8 = vld [vmem:[#allocation2 + $0xf68] sm:$0xff]  }
 0x1e3   :  { %v6766_v17 = vpop.f32.mrf.mxu0  ;;  %v6787_v20 = vadd.f32 %v6786_v16, %v6785_v11  ;;  %5819 = vmatprep.mubr.bf16.mxu1 %v1489_v62  ;;  %v7643_v11 = vld [vmem:[#allocation2 + $0xfb0] sm:$0xff]  }
 0x1e4   :  { %v5222_v19 = vadd.f32 %v6765_v14, %v7883_v43  ;;  %v6788_v22 = vpop.f32.mrf.mxu1  ;;  %7058 = vmatpush3.bf16.msra.mxu0 %v7610_v13  ;;  %v7630_v43 = vld [vmem:[#allocation2 + $0xe08] sm:$0xff]  }
 0x1e5   :  { %v6767_v23 = vpop.f32.mrf.mxu0  ;;  %7059 = vmatprep.subr.bf16.mxu0 %v7612_v15  ;;  %7080 = vmatpush3.bf16.msra.mxu1 %v7611_v18  ;;  %v7645_v14 = vld [vmem:[#allocation2 + $0xfe8] sm:$0xff]   ;;  %v7649_v22 = vld [vmem:[#allocation2 + $0xfe0] sm:$0xff]  }
 0x1e6   :  { %v7888_v25 = vadd.f32 %v6787_v20, %v5222_v19  ;;  %v6789_v27 = vpop.f32.mrf.mxu1  ;;  %7081 = vmatprep.subr.bf16.mxu1 %v7613_v21  ;;  %v7646_v17 = vld [vmem:[#allocation2 + $0xf28] sm:$0xff]   ;;  %v7648_v19 = vld [vmem:[#allocation2 + $0xf60] sm:$0xff]  }
 0x1e7   :  { %v7647_v21 = vld [vmem:[#allocation2 + $0xfa8] sm:$0xff]   ;;  %v7650_v23 = vld [vmem:[#allocation2 + $0xf20] sm:$0xff]   ;;  %v7654_v27 = vld [vmem:[#allocation2 + $0xf18] sm:$0xff]  }
 0x1e8   :  { %7060 = vmatpush3.bf16.msra.mxu0 %v7614_v24  ;;  %v7652_v24 = vld [vmem:[#allocation2 + $0xf58] sm:$0xff]  }
 0x1e9   :  { %7061 = vmatprep.subr.bf16.mxu0 %v7616_v26  ;;  %7082 = vmatpush3.bf16.msra.mxu1 %v7615_v28  ;;  %v7653_v26 = vld [vmem:[#allocation2 + $0xfd8] sm:$0xff]   ;;  %v7656_v28 = vld [vmem:[#allocation2 + $0xf50] sm:$0xff]  }
 0x1ea   :  { %7083 = vmatprep.subr.bf16.mxu1 %v7617_v29  ;;  %v7655_v29 = vld [vmem:[#allocation2 + $0xf98] sm:$0xff]  }
 0x1ec   :  { %7062 = vmatpush3.bf16.msra.mxu0 %v7618_v30  ;;  %v7657_v30 = vld [vmem:[#allocation2 + $0xfd0] sm:$0xff]  }
 0x1ed   :  { %7063 = vmatprep.subr.bf16.mxu0 %v7620_v31  ;;  %7084 = vmatpush3.bf16.msra.mxu1 %v7619_v32  ;;  %v7658_v31 = vld [vmem:[#allocation2 + $0xf10] sm:$0xff]   ;;  %v7660_v32 = vld [vmem:[#allocation2 + $0xf48] sm:$0xff]  }
 0x1ee   :  { %7085 = vmatprep.subr.bf16.mxu1 %v7621_v33  ;;  %v7659_v33 = vld [vmem:[#allocation2 + $0xf90] sm:$0xff]  }
 0x1f0   :  { %7064 = vmatpush3.bf16.msra.mxu0 %v7622_v34  ;;  %v7661_v34 = vld [vmem:[#allocation2 + $0xfc8] sm:$0xff]  }
 0x1f1   :  { %7065 = vmatprep.subr.bf16.mxu0 %v7624_v36  ;;  %7086 = vmatpush3.bf16.msra.mxu1 %v7623_v37  ;;  %v7662_v36 = vld [vmem:[#allocation2 + $0xf08] sm:$0xff]   ;;  %v7664_v37 = vld [vmem:[#allocation2 + $0xf40] sm:$0xff]  }
 0x1f2   :  { %7087 = vmatprep.subr.bf16.mxu1 %v7625_v38  ;;  %v7663_v38 = vld [vmem:[#allocation2 + $0xf88] sm:$0xff]  }
 0x1f4   :  { %7066 = vmatpush3.bf16.msra.mxu0 %v7626_v39  ;;  %v7665_v39 = vld [vmem:[#allocation2 + $0xfc0] sm:$0xff]  }
 0x1f5   :  { %7067 = vmatprep.subr.bf16.mxu0 %v7628_v40  ;;  %7088 = vmatpush3.bf16.msra.mxu1 %v7627_v41  ;;  %v7666_v40 = vld [vmem:[#allocation2 + $0xf00] sm:$0xff]   ;;  %v1472_v41 = vrot.slane %v7896_v55, %v7767_v35 }
 0x1f6   :  { %7089 = vmatprep.subr.bf16.mxu1 %v7629_v42  ;;  %v7667_v42 = vld [vmem:[#allocation2 + $0xf80] sm:$0xff]  }
 0x1f8   :  { %7068 = vmatpush3.bf16.msra.mxu0 %v7630_v43  ;;  %v1488_v43 = vcombine.high %v1472_v41, %v1472_v41 }
 0x1f9   :  { %7069 = vmatprep.subr.bf16.mxu0 %v7632_v44  ;;  %7090 = vmatpush3.bf16.msra.mxu1 %v7631_v45 }
 0x1fa   :  { %7091 = vmatprep.subr.bf16.mxu1 %v7633_v46 }
 0x1fc   :  { %7070 = vmatpush3.bf16.msra.mxu0 %v7634_v48 }
 0x1fd   :  { %7099 = vmatprep.subr.bf16.mxu0 %v7636_v51  ;;  %7092 = vmatpush3.bf16.msra.mxu1 %v7635_v52 }
 0x1fe   :  { %7121 = vmatprep.subr.bf16.mxu1 %v7637_v56 }
 0x1ff   :  { %v6807_v63 = vpop.f32.mrf.mxu0  ;;  %5780 = vmatmul.mubr.bf16.vlgmr.msra.gmra.mxu0 %v1465_v54 }
 0x200   :  { %v6829_v3 = vpop.f32.mrf.mxu1  ;;  %7100 = vmatpush3.bf16.msra.mxu0 %v7638_v58  ;;  %5820 = vmatmul.mubr.bf16.vlgmr.msra.gmra.mxu1 %v1487_v60 }
 0x201   :  { %v6808_v4 = vpop.f32.mrf.mxu0  ;;  %7101 = vmatprep.subr.bf16.mxu0 %v7640_v61  ;;  %7122 = vmatpush3.bf16.msra.mxu1 %v7639_v0 }
 0x202   :  { %v6809_v7 = vadd.f32 %v6808_v4, %v6807_v63  ;;  %v6830_v9 = vpop.f32.mrf.mxu1  ;;  %5859 = vmatprep.mubr.bf16.mxu0 %v1486_v1  ;;  %7123 = vmatprep.subr.bf16.mxu1 %v7641_v2 }
 0x203   :  { %v6810_v10 = vpop.f32.mrf.mxu0  ;;  %v6831_v13 = vadd.f32 %v6830_v9, %v6829_v3  ;;  %5899 = vmatprep.mubr.bf16.mxu1 %v1490_v6 }
 0x204   :  { %v5302_v12 = vadd.f32 %v6809_v7, %v7888_v25  ;;  %v6832_v15 = vpop.f32.mrf.mxu1  ;;  %7102 = vmatpush3.bf16.msra.mxu0 %v7642_v5  ;;  %v7651_v25 = vld [vmem:[#allocation2 + $0xfa0] sm:$0xff]  }
 0x205   :  { %v6811_v16 = vpop.f32.mrf.mxu0  ;;  %7103 = vmatprep.subr.bf16.mxu0 %v7644_v8  ;;  %7124 = vmatpush3.bf16.msra.mxu1 %v7643_v11  ;;  %v5926_v7 = vld [vmem:[#allocation5] ss:$0 sm:$0xff] }
 0x206   :  { %v5342_v18 = vadd.f32 %v6831_v13, %v5302_v12  ;;  %v6833_v20 = vpop.f32.mrf.mxu1  ;;  %7125 = vmatprep.subr.bf16.mxu1 %v7645_v14  ;;  %53 = vst [vmem:[#allocation7] sm:$0x3] %v5926_v7 }
 0x208   :  { %7104 = vmatpush3.bf16.msra.mxu0 %v7646_v17 }
 0x209   :  { %7105 = vmatprep.subr.bf16.mxu0 %v7648_v19  ;;  %7126 = vmatpush3.bf16.msra.mxu1 %v7647_v21 }
 0x20a   :  { %7127 = vmatprep.subr.bf16.mxu1 %v7649_v22 }
 0x20c   :  { %7106 = vmatpush3.bf16.msra.mxu0 %v7650_v23 }
 0x20d   :  { %7107 = vmatprep.subr.bf16.mxu0 %v7652_v24  ;;  %7128 = vmatpush3.bf16.msra.mxu1 %v7651_v25 }
 0x20e   :  { %7129 = vmatprep.subr.bf16.mxu1 %v7653_v26 }
 0x210   :  { %7108 = vmatpush3.bf16.msra.mxu0 %v7654_v27 }
 0x211   :  { %7109 = vmatprep.subr.bf16.mxu0 %v7656_v28  ;;  %7130 = vmatpush3.bf16.msra.mxu1 %v7655_v29 }
 0x212   :  { %7131 = vmatprep.subr.bf16.mxu1 %v7657_v30 }
 0x214   :  { %7110 = vmatpush3.bf16.msra.mxu0 %v7658_v31 }
 0x215   :  { %7111 = vmatprep.subr.bf16.mxu0 %v7660_v32  ;;  %7132 = vmatpush3.bf16.msra.mxu1 %v7659_v33 }
 0x216   :  { %7133 = vmatprep.subr.bf16.mxu1 %v7661_v34 }
 0x218   :  { %7112 = vmatpush3.bf16.msra.mxu0 %v7662_v36 }
 0x219   :  { %7113 = vmatprep.subr.bf16.mxu0 %v7664_v37  ;;  %7134 = vmatpush3.bf16.msra.mxu1 %v7663_v38 }
 0x21a   :  { %7135 = vmatprep.subr.bf16.mxu1 %v7665_v39 }
 0x21c   :  { %7114 = vmatpush3.bf16.msra.mxu0 %v7666_v40 }
 0x21d   :  { %7136 = vmatpush3.bf16.msra.mxu1 %v7667_v42 }
 0x21f   :  { %v6851_v44 = vpop.f32.mrf.mxu0  ;;  %5860 = vmatmul.mubr.bf16.vlgmr.msra.gmra.mxu0 %v1472_v41 }
 0x220   :  { %v6873_v45 = vpop.f32.mrf.mxu1  ;;  %5900 = vmatmul.mubr.bf16.vlgmr.msra.gmra.mxu1 %v1488_v43 }
 0x221   :  { %v6852_v46 = vpop.f32.mrf.mxu0 }
 0x222   :  { %v6853_v47 = vadd.f32 %v6852_v46, %v6851_v44  ;;  %v6874_v48 = vpop.f32.mrf.mxu1 }
 0x223   :  { %v6854_v49 = vpop.f32.mrf.mxu0  ;;  %v6875_v51 = vadd.f32 %v6874_v48, %v6873_v45 }
 0x224   :  { %v5382_v50 = vadd.f32 %v6853_v47, %v5342_v18  ;;  %v6876_v52 = vpop.f32.mrf.mxu1 }
 0x225   :  { %v6855_v53 = vpop.f32.mrf.mxu0 }
 0x226   :  { %v5422_v54 = vadd.f32 %v6875_v51, %v5382_v50  ;;  %v6877_v35 = vpop.f32.mrf.mxu1 }
 0x23f   :  { %v6895_v55 = vpop.f32.mrf.mxu0 }
 0x240   :  { %v6917_v56 = vpop.f32.mrf.mxu1 }
 0x241   :  { %v6896_v57 = vpop.f32.mrf.mxu0 }
 0x242   :  { %v6897_v58 = vadd.f32 %v6896_v57, %v6895_v55  ;;  %v6918_v59 = vpop.f32.mrf.mxu1 }
 0x243   :  { %v6898_v60 = vpop.f32.mrf.mxu0  ;;  %v6919_v62 = vadd.f32 %v6918_v59, %v6917_v56 }
 0x244   :  { %v5462_v61 = vadd.f32 %v6897_v58, %v5422_v54  ;;  %v6920_v63 = vpop.f32.mrf.mxu1  ;;  %v66_v60 = vld [vmem:[#allocation7] sm:$0x3] }
 0x245   :  { %v6899_v0 = vpop.f32.mrf.mxu0 }
 0x246   :  { %v5502_v1 = vadd.f32 %v6919_v62, %v5462_v61  ;;  %v6921_v2 = vpop.f32.mrf.mxu1 }
 0x25f   :  { %v6939_v3 = vpop.f32.mrf.mxu0 }
 0x260   :  { %v6961_v4 = vpop.f32.mrf.mxu1 }
 0x261   :  { %v6940_v5 = vpop.f32.mrf.mxu0 }
 0x262   :  { %v6941_v6 = vadd.f32 %v6940_v5, %v6939_v3  ;;  %v6962_v8 = vpop.f32.mrf.mxu1 }
 0x263   :  { %v6942_v9 = vpop.f32.mrf.mxu0  ;;  %v6963_v11 = vadd.f32 %v6962_v8, %v6961_v4 }
 0x264   :  { %v5542_v10 = vadd.f32 %v6941_v6, %v5502_v1  ;;  %v6964_v12 = vpop.f32.mrf.mxu1 }
 0x265   :  { %v6943_v13 = vpop.f32.mrf.mxu0 }
 0x266   :  { %v5582_v14 = vadd.f32 %v6963_v11, %v5542_v10  ;;  %v6965_v15 = vpop.f32.mrf.mxu1 }
 0x27f   :  { %v6983_v16 = vpop.f32.mrf.mxu0 }
 0x280   :  { %v7005_v17 = vpop.f32.mrf.mxu1 }
 0x281   :  { %v6984_v18 = vpop.f32.mrf.mxu0 }
 0x282   :  { %v6985_v19 = vadd.f32 %v6984_v18, %v6983_v16  ;;  %v7006_v20 = vpop.f32.mrf.mxu1 }
 0x283   :  { %v6986_v21 = vpop.f32.mrf.mxu0  ;;  %v7007_v23 = vadd.f32 %v7006_v20, %v7005_v17 }
 0x284   :  { %v5622_v22 = vadd.f32 %v6985_v19, %v5582_v14  ;;  %v7008_v24 = vpop.f32.mrf.mxu1 }
 0x285   :  { %v6987_v25 = vpop.f32.mrf.mxu0 }
 0x286   :  { %v5662_v26 = vadd.f32 %v7007_v23, %v5622_v22  ;;  %v7009_v27 = vpop.f32.mrf.mxu1 }
 0x29f   :  { %v7027_v28 = vpop.f32.mrf.mxu0 }
 0x2a0   :  { %v7049_v29 = vpop.f32.mrf.mxu1 }
 0x2a1   :  { %v7028_v30 = vpop.f32.mrf.mxu0 }
 0x2a2   :  { %v7050_v31 = vpop.f32.mrf.mxu1  ;;  %v7029_v45 = vadd.f32 %v7028_v30, %v7027_v28 }
 0x2a3   :  { %v7030_v32 = vpop.f32.mrf.mxu0  ;;  %v7051_v47 = vadd.f32 %v7050_v31, %v7049_v29 }
 0x2a4   :  { %v7052_v33 = vpop.f32.mrf.mxu1  ;;  %v5702_v46 = vadd.f32 %v7029_v45, %v5662_v26 }
 0x2a5   :  { %v7031_v34 = vpop.f32.mrf.mxu0 }
 0x2a6   :  { %v7053_v36 = vpop.f32.mrf.mxu1  ;;  %v5742_v49 = vadd.f32 %v7051_v47, %v5702_v46 }
 0x2bf   :  { %v7071_v37 = vpop.f32.mrf.mxu0 }
 0x2c0   :  { %v7093_v38 = vpop.f32.mrf.mxu1 }
 0x2c1   :  { %v7072_v39 = vpop.f32.mrf.mxu0 }
 0x2c2   :  { %v7094_v40 = vpop.f32.mrf.mxu1  ;;  %v7073_v48 = vadd.f32 %v7072_v39, %v7071_v37 }
 0x2c3   :  { %v7074_v41 = vpop.f32.mrf.mxu0  ;;  %v7095_v51 = vadd.f32 %v7094_v40, %v7093_v38 }
 0x2c4   :  { %v7096_v42 = vpop.f32.mrf.mxu1  ;;  %v5782_v50 = vadd.f32 %v7073_v48, %v5742_v49 }
 0x2c5   :  { %v7075_v43 = vpop.f32.mrf.mxu0 }
 0x2c6   :  { %v7097_v44 = vpop.f32.mrf.mxu1  ;;  %v5822_v35 = vadd.f32 %v7095_v51, %v5782_v50 }
 0x2df   :  { %v7115_v52 = vpop.f32.mrf.mxu0 }
 0x2e0   :  { %v7137_v53 = vpop.f32.mrf.mxu1 }
 0x2e1   :  { %v7116_v54 = vpop.f32.mrf.mxu0 }
 0x2e2   :  { %v7117_v55 = vadd.f32 %v7116_v54, %v7115_v52  ;;  %v7138_v56 = vpop.f32.mrf.mxu1 }
 0x2e3   :  { %v7118_v57 = vpop.f32.mrf.mxu0  ;;  %v7139_v59 = vadd.f32 %v7138_v56, %v7137_v53 }
 0x2e4   :  { %v5862_v58 = vadd.f32 %v7117_v55, %v5822_v35  ;;  %v7140_v61 = vpop.f32.mrf.mxu1 }
 0x2e5   :  { %v7119_v62 = vpop.f32.mrf.mxu0 }
 0x2e6   :  { %v5902_v63 = vadd.f32 %v7139_v59, %v5862_v58  ;;  %v7141_v0 = vpop.f32.mrf.mxu1 }
 0x2e8   :  { %v5907_v1 = vadd.f32 %v5902_v63, %v66_v60 }
 0x2ea   :  { %5908 = vst [vmem:[#allocation7] sm:$0x3] %v5907_v1 }
 0x2eb   :  { %7720 = shalt.err (!%p7717_p0)
}
 0x2ec   :  { %5918 = dma.vmem_to_hbm [thread:$0]  %s5916_s12, 32, %s7911_s3, [#allocation4]  }
 0x2ed   :  { %7733 = dma.done.wait [#allocation4], 32  }
 0x2ee   :  { %7734 = vsyncadd [#allocation4], 4294967264 }
 0x2ef   :  { %5922 = vsyncpa [#allocation3], 1 }
 0x2f0   :  { %5923 = vsyncpa [#allocation6], 1 }
 0x2f1   :  { %5924 = vsyncpa [#allocation4], 1 }

</bundles_post_ra>
